<compile_context>
chip_gen: v7x
topology: tpu7x:2x2x1
jax: 0.10.0
libtpu: 0.0.40
codegen_flags: <defaults>
</compile_context>

<pallas_src>
from math import sqrt

import jax
import jax.numpy as jnp
import numpy as np
from jax.experimental import pallas as pl
from jax.experimental.pallas import tpu as pltpu


def _resblock_kernel(x_ref, w1_ref, b1_ref, w2_ref, b2_ref, w3_ref, b3_ref,
                     o_ref):
    # x_ref : (1, H, W, C)  unpadded input tile for one batch element
    # w1/w2 : (9*C, C) bf16 im2col-reshaped 3x3 weights
    # w3    : (C, C)   bf16 1x1 weight
    # b*    : (1, C)   f32 biases
    # o_ref : (1, H, W, C)
    _, H, W, C = x_ref.shape
    x = x_ref[0].astype(jnp.float32)                       # (H, W, C)

    def conv3x3_relu(src, w_ref, b_ref):
        # ReLU(conv3x3(src, SAME) + b) as (H*W, C) f32, via a single im2col
        # matmul (H*W, 9C) @ (9C, C) on the MXU with f32 accumulation.
        zc = jnp.zeros((H, 1, C), src.dtype)
        xc = jnp.concatenate([zc, src, zc], axis=1)        # (H, W+2, C)
        # dx-minor tap grouping: lane blocks [dx=0 | dx=1 | dx=2]
        q = jnp.concatenate(
            [xc[:, 0:W, :], xc[:, 1:W + 1, :], xc[:, 2:W + 2, :]],
            axis=-1)                                       # (H, W, 3C)
        zr = jnp.zeros((1, W, 3 * C), src.dtype)
        qp = jnp.concatenate([zr, q, zr], axis=0)          # (H+2, W, 3C)
        # dy-major tap grouping: lane blocks [dy=0 | dy=1 | dy=2]
        patches = jnp.concatenate([qp[0:H], qp[1:H + 1], qp[2:H + 2]],
                                  axis=-1)                 # (H, W, 9C)
        patches = patches.reshape(H * W, 9 * C).astype(jnp.bfloat16)
        acc = jnp.dot(patches, w_ref[...],
                      preferred_element_type=jnp.float32)  # (H*W, C) f32
        return jnp.maximum(acc + b_ref[0], 0.0)            # bias + ReLU fused

    # conv1 (3x3, pad=1) + ReLU
    h1 = conv3x3_relu(x, w1_ref, b1_ref)                   # (H*W, C)
    # conv2 (3x3, pad=1) + ReLU  (re-padding happens inside the helper)
    h2 = conv3x3_relu(h1.reshape(H, W, C), w2_ref, b2_ref)
    # conv3 (1x1)
    h3 = jnp.dot(h2.astype(jnp.bfloat16), w3_ref[...],
                 preferred_element_type=jnp.float32) + b3_ref[0]
    # residual add in f32
    out = h3 + x.reshape(H * W, C)
    o_ref[0] = out.reshape(H, W, C).astype(o_ref.dtype)


def resblock_pallas(x_nchw, params):
    """ResBlock forward. x_nchw: (B, C, H, W) like PyTorch."""
    w1, b1, w2, b2, w3, b3 = params
    x = jnp.transpose(x_nchw, (0, 2, 3, 1))                # -> NHWC
    B, H, W, C = x.shape

    # One-time glue: im2col weight layout + bf16 cast for the MXU.
    w1m = w1.reshape(9 * C, C).astype(jnp.bfloat16)
    w2m = w2.reshape(9 * C, C).astype(jnp.bfloat16)
    w3m = w3.astype(jnp.bfloat16)
    b1m = b1.reshape(1, C).astype(jnp.float32)
    b2m = b2.reshape(1, C).astype(jnp.float32)
    b3m = b3.reshape(1, C).astype(jnp.float32)

    out_nhwc = pl.pallas_call(
        _resblock_kernel,
        out_shape=jax.ShapeDtypeStruct((B, H, W, C), x.dtype),
        grid_spec=pltpu.PrefetchScalarGridSpec(
            num_scalar_prefetch=0,
            grid=(B,),
            in_specs=[
                pl.BlockSpec((1, H, W, C), lambda b: (b, 0, 0, 0)),
                pl.BlockSpec((9 * C, C), lambda b: (0, 0)),
                pl.BlockSpec((1, C), lambda b: (0, 0)),
                pl.BlockSpec((9 * C, C), lambda b: (0, 0)),
                pl.BlockSpec((1, C), lambda b: (0, 0)),
                pl.BlockSpec((C, C), lambda b: (0, 0)),
                pl.BlockSpec((1, C), lambda b: (0, 0)),
            ],
            out_specs=pl.BlockSpec((1, H, W, C), lambda b: (b, 0, 0, 0)),
        ),
        compiler_params=pltpu.CompilerParams(
            dimension_semantics=("parallel",)),
    )(x, w1m, b1m, w2m, b2m, w3m, b3m)

    return jnp.transpose(out_nhwc, (0, 3, 1, 2))           # -> NCHW


def resblock_reference(x_nchw, params):
    """Pure-JAX f32 reference (mirrors PyTorch conv semantics)."""
    w1, b1, w2, b2, w3, b3 = params
    x = jnp.transpose(x_nchw, (0, 2, 3, 1)).astype(jnp.float32)
    dn = ("NHWC", "HWIO", "NHWC")
    hp = jax.lax.Precision.HIGHEST
    h = jax.lax.conv_general_dilated(x, w1, (1, 1), "SAME",
                                     dimension_numbers=dn, precision=hp) + b1
    h = jnp.maximum(h, 0.0)
    h = jax.lax.conv_general_dilated(h, w2, (1, 1), "SAME",
                                     dimension_numbers=dn, precision=hp) + b2
    h = jnp.maximum(h, 0.0)
    h = jnp.einsum("nhwc,cd->nhwd", h, w3, precision=hp) + b3
    return jnp.transpose(h + x, (0, 3, 1, 2)).astype(x_nchw.dtype)


def init_params(key, chan):
    """Deterministic synthetic parameters (Kaiming-ish scaling), HWIO layout."""
    ks = jax.random.split(key, 6)
    s3 = 1.0 / sqrt(chan * 9)
    s1 = 1.0 / sqrt(chan)
    w1 = jax.random.normal(ks[0], (3, 3, chan, chan), jnp.float32) * s3
    b1 = jax.random.normal(ks[1], (chan,), jnp.float32) * s3
    w2 = jax.random.normal(ks[2], (3, 3, chan, chan), jnp.float32) * s3
    b2 = jax.random.normal(ks[3], (chan,), jnp.float32) * s3
    w3 = jax.random.normal(ks[4], (chan, chan), jnp.float32) * s1
    b3 = jax.random.normal(ks[5], (chan,), jnp.float32) * s1
    return (w1, b1, w2, b2, w3, b3)


if __name__ == "__main__":
    key = jax.random.PRNGKey(0)
    k_x, k_p = jax.random.split(key)

    B, C, H, W = 2, 4, 16, 16                    # NCHW, like the PyTorch module
    x = jax.random.normal(k_x, (B, C, H, W), jnp.float32)
    params = init_params(k_p, C)

    resblock_jit = jax.jit(resblock_pallas)
    out = jax.block_until_ready(resblock_jit(x, params))
    ref = jax.block_until_ready(resblock_reference(x, params))

    # bf16 MXU operands vs. the f32 reference -> slightly loosened tolerance.
    np.testing.assert_allclose(np.asarray(out), np.asarray(ref),
                               rtol=3e-2, atol=3e-2)
    assert out.shape == (B, C, H, W) and out.dtype == x.dtype
    print("KERNEL_OK")
</pallas_src>

<mosaic_0001>
module attributes {stable_mosaic.version = 11 : i64} {
  func.func @_resblock_kernel(%arg0: i32, %arg1: memref<1x16x16x4xf32, #tpu.memory_space<vmem>>, %arg2: memref<36x4xbf16, #tpu.memory_space<vmem>>, %arg3: memref<1x4xf32, #tpu.memory_space<vmem>>, %arg4: memref<36x4xbf16, #tpu.memory_space<vmem>>, %arg5: memref<1x4xf32, #tpu.memory_space<vmem>>, %arg6: memref<4x4xbf16, #tpu.memory_space<vmem>>, %arg7: memref<1x4xf32, #tpu.memory_space<vmem>>, %arg8: memref<1x16x16x4xf32, #tpu.memory_space<vmem>>) attributes {dimension_semantics = [#tpu.dimension_semantics<parallel>], iteration_bounds = array<i64: 2>, scalar_prefetch = 0 : i64, scratch_operands = 0 : i64, tpu.core_type = #tpu.core_type<tc>, window_params = [{transform_indices = @transform_0, window_bounds = array<i64: 1, 16, 16, 4>}, {pipeline_mode = #tpu.pipeline_mode<synchronous>, transform_indices = @transform_1, window_bounds = array<i64: 36, 4>}, {pipeline_mode = #tpu.pipeline_mode<synchronous>, transform_indices = @transform_2, window_bounds = array<i64: 1, 4>}, {pipeline_mode = #tpu.pipeline_mode<synchronous>, transform_indices = @transform_3, window_bounds = array<i64: 36, 4>}, {pipeline_mode = #tpu.pipeline_mode<synchronous>, transform_indices = @transform_4, window_bounds = array<i64: 1, 4>}, {pipeline_mode = #tpu.pipeline_mode<synchronous>, transform_indices = @transform_5, window_bounds = array<i64: 4, 4>}, {pipeline_mode = #tpu.pipeline_mode<synchronous>, transform_indices = @transform_6, window_bounds = array<i64: 1, 4>}, {transform_indices = @transform_7, window_bounds = array<i64: 1, 16, 16, 4>}]} {
    %c0 = arith.constant 0 : index
    %c0_0 = arith.constant 0 : index
    %c0_1 = arith.constant 0 : index
    %c0_2 = arith.constant 0 : index
    %0 = vector.load %arg1[%c0, %c0_0, %c0_1, %c0_2] : memref<1x16x16x4xf32, #tpu.memory_space<vmem>>, vector<1x16x16x4xf32>
    %1 = vector.shape_cast %0 : vector<1x16x16x4xf32> to vector<16x16x4xf32>
    %cst = arith.constant 0.000000e+00 : f32
    %2 = vector.broadcast %cst : f32 to vector<16x1x4xf32>
    %3 = tpu.concatenate %2, %1, %2 in 1 : vector<16x1x4xf32>, vector<16x16x4xf32>, vector<16x1x4xf32> -> vector<16x18x4xf32>
    %4 = vector.extract_strided_slice %3 {offsets = [0, 0, 0], sizes = [16, 16, 4], strides = [1, 1, 1]} : vector<16x18x4xf32> to vector<16x16x4xf32>
    %5 = vector.extract_strided_slice %3 {offsets = [0, 1, 0], sizes = [16, 16, 4], strides = [1, 1, 1]} : vector<16x18x4xf32> to vector<16x16x4xf32>
    %6 = vector.extract_strided_slice %3 {offsets = [0, 2, 0], sizes = [16, 16, 4], strides = [1, 1, 1]} : vector<16x18x4xf32> to vector<16x16x4xf32>
    %7 = tpu.concatenate %4, %5, %6 in 2 : vector<16x16x4xf32>, vector<16x16x4xf32>, vector<16x16x4xf32> -> vector<16x16x12xf32>
    %cst_3 = arith.constant 0.000000e+00 : f32
    %8 = vector.broadcast %cst_3 : f32 to vector<1x16x12xf32>
    %9 = tpu.concatenate %8, %7, %8 in 0 : vector<1x16x12xf32>, vector<16x16x12xf32>, vector<1x16x12xf32> -> vector<18x16x12xf32>
    %10 = vector.extract_strided_slice %9 {offsets = [0, 0, 0], sizes = [16, 16, 12], strides = [1, 1, 1]} : vector<18x16x12xf32> to vector<16x16x12xf32>
    %11 = vector.extract_strided_slice %9 {offsets = [1, 0, 0], sizes = [16, 16, 12], strides = [1, 1, 1]} : vector<18x16x12xf32> to vector<16x16x12xf32>
    %12 = vector.extract_strided_slice %9 {offsets = [2, 0, 0], sizes = [16, 16, 12], strides = [1, 1, 1]} : vector<18x16x12xf32> to vector<16x16x12xf32>
    %13 = tpu.concatenate %10, %11, %12 in 2 : vector<16x16x12xf32>, vector<16x16x12xf32>, vector<16x16x12xf32> -> vector<16x16x36xf32>
    %14 = vector.shape_cast %13 : vector<16x16x36xf32> to vector<256x36xf32>
    %15 = arith.truncf %14 : vector<256x36xf32> to vector<256x36xbf16>
    %c0_4 = arith.constant 0 : index
    %c0_5 = arith.constant 0 : index
    %16 = vector.load %arg2[%c0_4, %c0_5] : memref<36x4xbf16, #tpu.memory_space<vmem>>, vector<36x4xbf16>
    %cst_6 = arith.constant dense<0.000000e+00> : vector<256x4xf32>
    %17 = tpu.matmul %15, %16, %cst_6 {dimension_numbers = #tpu.dot_dimension_numbers<[1], [0], [0], [1], [0, 0, 1, 1], [], []>} : vector<256x36xbf16>, vector<36x4xbf16>, vector<256x4xf32> -> vector<256x4xf32>
    %c0_7 = arith.constant 0 : index
    %c0_8 = arith.constant 0 : index
    %18 = vector.load %arg3[%c0_7, %c0_8] : memref<1x4xf32, #tpu.memory_space<vmem>>, vector<1x4xf32>
    %19 = vector.shape_cast %18 : vector<1x4xf32> to vector<4xf32>
    %20 = vector.shape_cast %19 : vector<4xf32> to vector<1x4xf32>
    %21 = vector.broadcast %20 : vector<1x4xf32> to vector<256x4xf32>
    %22 = arith.addf %17, %21 : vector<256x4xf32>
    %cst_9 = arith.constant 0.000000e+00 : f32
    %23 = vector.broadcast %cst_9 : f32 to vector<256x4xf32>
    %24 = arith.maximumf %22, %23 : vector<256x4xf32>
    %25 = vector.shape_cast %24 : vector<256x4xf32> to vector<16x16x4xf32>
    %cst_10 = arith.constant 0.000000e+00 : f32
    %26 = vector.broadcast %cst_10 : f32 to vector<16x1x4xf32>
    %27 = tpu.concatenate %26, %25, %26 in 1 : vector<16x1x4xf32>, vector<16x16x4xf32>, vector<16x1x4xf32> -> vector<16x18x4xf32>
    %28 = vector.extract_strided_slice %27 {offsets = [0, 0, 0], sizes = [16, 16, 4], strides = [1, 1, 1]} : vector<16x18x4xf32> to vector<16x16x4xf32>
    %29 = vector.extract_strided_slice %27 {offsets = [0, 1, 0], sizes = [16, 16, 4], strides = [1, 1, 1]} : vector<16x18x4xf32> to vector<16x16x4xf32>
    %30 = vector.extract_strided_slice %27 {offsets = [0, 2, 0], sizes = [16, 16, 4], strides = [1, 1, 1]} : vector<16x18x4xf32> to vector<16x16x4xf32>
    %31 = tpu.concatenate %28, %29, %30 in 2 : vector<16x16x4xf32>, vector<16x16x4xf32>, vector<16x16x4xf32> -> vector<16x16x12xf32>
    %cst_11 = arith.constant 0.000000e+00 : f32
    %32 = vector.broadcast %cst_11 : f32 to vector<1x16x12xf32>
    %33 = tpu.concatenate %32, %31, %32 in 0 : vector<1x16x12xf32>, vector<16x16x12xf32>, vector<1x16x12xf32> -> vector<18x16x12xf32>
    %34 = vector.extract_strided_slice %33 {offsets = [0, 0, 0], sizes = [16, 16, 12], strides = [1, 1, 1]} : vector<18x16x12xf32> to vector<16x16x12xf32>
    %35 = vector.extract_strided_slice %33 {offsets = [1, 0, 0], sizes = [16, 16, 12], strides = [1, 1, 1]} : vector<18x16x12xf32> to vector<16x16x12xf32>
    %36 = vector.extract_strided_slice %33 {offsets = [2, 0, 0], sizes = [16, 16, 12], strides = [1, 1, 1]} : vector<18x16x12xf32> to vector<16x16x12xf32>
    %37 = tpu.concatenate %34, %35, %36 in 2 : vector<16x16x12xf32>, vector<16x16x12xf32>, vector<16x16x12xf32> -> vector<16x16x36xf32>
    %38 = vector.shape_cast %37 : vector<16x16x36xf32> to vector<256x36xf32>
    %39 = arith.truncf %38 : vector<256x36xf32> to vector<256x36xbf16>
    %c0_12 = arith.constant 0 : index
    %c0_13 = arith.constant 0 : index
    %40 = vector.load %arg4[%c0_12, %c0_13] : memref<36x4xbf16, #tpu.memory_space<vmem>>, vector<36x4xbf16>
    %cst_14 = arith.constant dense<0.000000e+00> : vector<256x4xf32>
    %41 = tpu.matmul %39, %40, %cst_14 {dimension_numbers = #tpu.dot_dimension_numbers<[1], [0], [0], [1], [0, 0, 1, 1], [], []>} : vector<256x36xbf16>, vector<36x4xbf16>, vector<256x4xf32> -> vector<256x4xf32>
    %c0_15 = arith.constant 0 : index
    %c0_16 = arith.constant 0 : index
    %42 = vector.load %arg5[%c0_15, %c0_16] : memref<1x4xf32, #tpu.memory_space<vmem>>, vector<1x4xf32>
    %43 = vector.shape_cast %42 : vector<1x4xf32> to vector<4xf32>
    %44 = vector.shape_cast %43 : vector<4xf32> to vector<1x4xf32>
    %45 = vector.broadcast %44 : vector<1x4xf32> to vector<256x4xf32>
    %46 = arith.addf %41, %45 : vector<256x4xf32>
    %cst_17 = arith.constant 0.000000e+00 : f32
    %47 = vector.broadcast %cst_17 : f32 to vector<256x4xf32>
    %48 = arith.maximumf %46, %47 : vector<256x4xf32>
    %49 = arith.truncf %48 : vector<256x4xf32> to vector<256x4xbf16>
    %c0_18 = arith.constant 0 : index
    %c0_19 = arith.constant 0 : index
    %50 = vector.load %arg6[%c0_18, %c0_19] : memref<4x4xbf16, #tpu.memory_space<vmem>>, vector<4x4xbf16>
    %cst_20 = arith.constant dense<0.000000e+00> : vector<256x4xf32>
    %51 = tpu.matmul %49, %50, %cst_20 {dimension_numbers = #tpu.dot_dimension_numbers<[1], [0], [0], [1], [0, 0, 1, 1], [], []>} : vector<256x4xbf16>, vector<4x4xbf16>, vector<256x4xf32> -> vector<256x4xf32>
    %c0_21 = arith.constant 0 : index
    %c0_22 = arith.constant 0 : index
    %52 = vector.load %arg7[%c0_21, %c0_22] : memref<1x4xf32, #tpu.memory_space<vmem>>, vector<1x4xf32>
    %53 = vector.shape_cast %52 : vector<1x4xf32> to vector<4xf32>
    %54 = vector.shape_cast %53 : vector<4xf32> to vector<1x4xf32>
    %55 = vector.broadcast %54 : vector<1x4xf32> to vector<256x4xf32>
    %56 = arith.addf %51, %55 : vector<256x4xf32>
    %57 = vector.shape_cast %1 : vector<16x16x4xf32> to vector<256x4xf32>
    %58 = arith.addf %56, %57 : vector<256x4xf32>
    %59 = vector.shape_cast %58 : vector<256x4xf32> to vector<16x16x4xf32>
    %c0_23 = arith.constant 0 : index
    %c0_24 = arith.constant 0 : index
    %c0_25 = arith.constant 0 : index
    %c0_26 = arith.constant 0 : index
    %60 = vector.load %arg8[%c0_23, %c0_24, %c0_25, %c0_26] : memref<1x16x16x4xf32, #tpu.memory_space<vmem>>, vector<1x16x16x4xf32>
    %61 = vector.shape_cast %60 : vector<1x16x16x4xf32> to vector<16x16x4xf32>
    %62 = vector.shape_cast %59 : vector<16x16x4xf32> to vector<1x16x16x4xf32>
    tpu.vector_store %arg8[%c0_23, %c0_24, %c0_25, %c0_26], %62 {strides = array<i32>} : memref<1x16x16x4xf32, #tpu.memory_space<vmem>>, vector<1x16x16x4xf32>,
    return
  }
  func.func @transform_0(%arg0: i32) -> (i32, i32, i32, i32) {
    %c0_i32 = arith.constant 0 : i32
    %c0_i32_0 = arith.constant 0 : i32
    %c0_i32_1 = arith.constant 0 : i32
    %c0_i32_2 = arith.constant 0 : i32
    return %arg0, %c0_i32, %c0_i32_0, %c0_i32_1 : i32, i32, i32, i32
  }
  func.func @transform_1(%arg0: i32) -> (i32, i32) {
    %c0_i32 = arith.constant 0 : i32
    %c0_i32_0 = arith.constant 0 : i32
    %c0_i32_1 = arith.constant 0 : i32
    return %c0_i32, %c0_i32_0 : i32, i32
  }
  func.func @transform_2(%arg0: i32) -> (i32, i32) {
    %c0_i32 = arith.constant 0 : i32
    %c0_i32_0 = arith.constant 0 : i32
    %c0_i32_1 = arith.constant 0 : i32
    return %c0_i32, %c0_i32_0 : i32, i32
  }
  func.func @transform_3(%arg0: i32) -> (i32, i32) {
    %c0_i32 = arith.constant 0 : i32
    %c0_i32_0 = arith.constant 0 : i32
    %c0_i32_1 = arith.constant 0 : i32
    return %c0_i32, %c0_i32_0 : i32, i32
  }
  func.func @transform_4(%arg0: i32) -> (i32, i32) {
    %c0_i32 = arith.constant 0 : i32
    %c0_i32_0 = arith.constant 0 : i32
    %c0_i32_1 = arith.constant 0 : i32
    return %c0_i32, %c0_i32_0 : i32, i32
  }
  func.func @transform_5(%arg0: i32) -> (i32, i32) {
    %c0_i32 = arith.constant 0 : i32
    %c0_i32_0 = arith.constant 0 : i32
    %c0_i32_1 = arith.constant 0 : i32
    return %c0_i32, %c0_i32_0 : i32, i32
  }
  func.func @transform_6(%arg0: i32) -> (i32, i32) {
    %c0_i32 = arith.constant 0 : i32
    %c0_i32_0 = arith.constant 0 : i32
    %c0_i32_1 = arith.constant 0 : i32
    return %c0_i32, %c0_i32_0 : i32, i32
  }
  func.func @transform_7(%arg0: i32) -> (i32, i32, i32, i32) {
    %c0_i32 = arith.constant 0 : i32
    %c0_i32_0 = arith.constant 0 : i32
    %c0_i32_1 = arith.constant 0 : i32
    %c0_i32_2 = arith.constant 0 : i32
    return %arg0, %c0_i32, %c0_i32_0, %c0_i32_1 : i32, i32, i32, i32
  }
}

</mosaic_0001>

<bundles_post_ra>
// kernel: resblock_pallas.1
= control target key start
LH: loop header
LB: loop body
LE: loop exit
PB: predicated region body
PF: predicated region fallthrough
CT: control target
= control target key end

     0   :  { %s4013_s24 = smov 0   ;;  %s5579_s0 = inlined_call_operand.vmem [shape: f32[2,16,16,4], index: 0, kind: input, shape index: {}]   ;;  %s5580_s1 = inlined_call_operand.vmem [shape: bf16[36,4], index: 1, kind: input, shape index: {}]   ;;  %s5581_s2 = inlined_call_operand.vmem [shape: f32[1,4], index: 2, kind: input, shape index: {}]   ;;  %s5582_s3 = inlined_call_operand.vmem [shape: bf16[36,4], index: 3, kind: input, shape index: {}]   ;;  %s5583_s4 = inlined_call_operand.vmem [shape: f32[1,4], index: 4, kind: input, shape index: {}]   ;;  %s5584_s5 = inlined_call_operand.vmem [shape: bf16[4,4], index: 5, kind: input, shape index: {}]   ;;  %s5585_s6 = inlined_call_operand.vmem [shape: f32[1,4], index: 6, kind: input, shape index: {}]   ;;  %s5586_s7 = inlined_call_operand.vmem [shape: f32[2,16,16,4], index: 7, kind: output, shape index: {}]  }
   0x1 LB: > { %s3034_s25 = sadd.s32 4294967295, %s3966_s24   ;;  %p3038_p0 = scmp.ge.s32.totalorder %s3966_s24, 1  ;;  %s3966_s24 = sphi %s4013_s24, %s17_s24  }
   0x2   : > { %p237_p1 = scmp.lt.s32.totalorder %s3966_s24, 3 }
   0x4   : > { %p238_p2 = pnand %p3038_p0, %p237_p1 }
   0x5   : > { %p269_p3 = scmp.lt.s32.totalorder (!%p238_p2), %s3034_s25, 1  ;;  %vm344_vm0 = vcmask (!%p238_p2), 1040384   ;;  %vm505_vm1 = vcmask (!%p238_p2), 1046528   ;;  %vm682_vm2 = vcmask (!%p238_p2), 1045504   ;;  %s3968_s30 = smov (!%p238_p2), 4   ;;  %vm859_vm3 = vcmask (!%p238_p2), 31744  }
   0x6   : > { %241 = sbr.rel (%p238_p2) target bundleno = 1274 (0x4fa), region = 48  ;;  %s3969_s8 = smov (!%p238_p2), 8   ;;  %vm892_vm4 = vcmask (!%p238_p2), 64512   ;;  %vm1305_vm5 = vcmask (!%p238_p2), 1041408   ;;  %vm1147_vm6 = vcmask (!%p238_p2), 97280   ;;  %vm1180_vm7 = vcmask (!%p238_p2), 195584  }
   0x7   : > { %s3970_s13 = smov (!%p238_p2), 12   ;;  %s3971_s16 = smov (!%p238_p2), 24   ;;  %vm1256_vm8 = vcmask (!%p238_p2), 293888  }
   0xd   : > { %s5588_s25 = smov (!%p269_p3, %s3034_s25), 1 }
   0xe   : > { %s3102_s26 = sshll.u32 %s5588_s25, 8 }
   0xf   : > { %s4029_s29 = scalar_lea.vmem %s5579_s0, %s3102_s26  ;;  %s5447_s14 = scalar_lea.vmem %s5586_s7, %s3102_s26 }
  0x10   : > { %v280_v0 = vld [vmem:[%s4029_s29] sm:$0xff]  ;;  %v281_v1 = vld [vmem:[%s4029_s29 + $0x8] sm:$0xff]  ;;  %v282_v2 = vld [vmem:[%s4029_s29 + $0x10] sm:$0xff] }
  0x11   : > { %v345_v3 = vrot.slane %v280_v0, 7  ;;  %v346_v4 = vrot.slane %v281_v1, 7  ;;  %v283_v5 = vld [vmem:[%s4029_s29 + $0x18] sm:$0xff]  ;;  %v348_v6 = vrot.slane %v282_v2, 7  ;;  %v284_v7 = vld [vmem:[%s4029_s29 + $0x20] sm:$0xff]  ;;  %v285_v8 = vld [vmem:[%s4029_s29 + $0x28] sm:$0xff] }
  0x12   : > { %v349_v9 = vrot.slane %v283_v5, 7  ;;  %v351_v10 = vrot.slane %v284_v7, 7  ;;  %v352_v11 = vrot.slane %v285_v8, 7  ;;  %v286_v40 = vld [vmem:[%s4029_s29 + $0x30] sm:$0xff]  ;;  %v287_v45 = vld [vmem:[%s4029_s29 + $0x38] sm:$0xff]  ;;  %v288_v50 = vld [vmem:[%s4029_s29 + $0x40] sm:$0xff] }
  0x13   : > { %v4038_v12 = vsel %vm344_vm0, %v345_v3, %v346_v4  ;;  %v4041_v13 = vsel %vm344_vm0, 0.0, %v345_v3  ;;  %v457_v14 = vsel %vm344_vm0, %v346_v4, 0.0  ;;  %v4045_v15 = vsel %vm344_vm0, 0.0, %v348_v6  ;;  %v289_v59 = vld [vmem:[%s4029_s29 + $0x48] sm:$0xff] }
  0x14   : > { %v506_v16 = vrot.slane %v4041_v13, 1  ;;  %v507_v17 = vrot.slane %v4038_v12, 1  ;;  %v509_v18 = vrot.slane %v457_v14, 1  ;;  %v683_v19 = vrot.slane %v4041_v13, 2 }
  0x15   : > { %v684_v20 = vrot.slane %v4038_v12, 2  ;;  %v686_v21 = vrot.slane %v457_v14, 2  ;;  %v4052_v22 = vsel %vm344_vm0, %v348_v6, %v349_v9  ;;  %v458_v23 = vsel %vm344_vm0, %v349_v9, 0.0 }
  0x16   : > { %v508_v24 = vsel %vm505_vm1, %v506_v16, %v507_v17  ;;  %v510_v25 = vsel %vm505_vm1, %v507_v17, %v509_v18  ;;  %v511_v26 = vrot.slane %v4045_v15, 1  ;;  %v512_v27 = vrot.slane %v4052_v22, 1 }
  0x17   : > { %v3292_v28 = vpack.i.bf16 %v510_v25, %v508_v24  ;;  %v685_v29 = vsel %vm682_vm2, %v683_v19, %v684_v20  ;;  %v687_v30 = vsel %vm682_vm2, %v684_v20, %v686_v21  ;;  %v514_v31 = vrot.slane %v458_v23, 1  ;;  %v290_v19 = vld [vmem:[%s4029_s29 + $0x50] sm:$0xff]  ;;  %v291_v25 = vld [vmem:[%s4029_s29 + $0x58] sm:$0xff] }
  0x18   : > { %v3302_v32 = vpack.i.bf16 %v687_v30, %v685_v29  ;;  %v513_v33 = vsel %vm505_vm1, %v511_v26, %v512_v27  ;;  %v4063_v34 = vsel %vm344_vm0, %v351_v10, %v352_v11  ;;  %v4066_v35 = vsel %vm344_vm0, 0.0, %v351_v10  ;;  %v292_v30 = vld [vmem:[%s4029_s29 + $0x60] sm:$0xff] }
  0x19   : > { %3293 = vrot.lane.b32.xlu0 %v3292_v28, %s3968_s30  ;;  %v515_v36 = vsel %vm505_vm1, %v512_v27, %v514_v31  ;;  %v459_v37 = vsel %vm344_vm0, %v352_v11, 0.0  ;;  %v516_v38 = vrot.slane %v4066_v35, 1  ;;  %v517_v39 = vrot.slane %v4063_v34, 1  ;;  %v293_v31 = vld [vmem:[%s4029_s29 + $0x68] sm:$0xff] }
  0x1a   : > { %3303 = vrot.lane.b32.xlu1 %v3302_v32, %s3969_s8  ;;  %v3297_v41 = vpack.i.bf16 %v515_v36, %v513_v33  ;;  %v519_v42 = vrot.slane %v459_v37, 1  ;;  %v688_v43 = vrot.slane %v4045_v15, 2  ;;  %v689_v44 = vrot.slane %v4052_v22, 2 }
  0x1b   : > { %v518_v46 = vsel %vm505_vm1, %v516_v38, %v517_v39  ;;  %v691_v47 = vrot.slane %v458_v23, 2  ;;  %v693_v48 = vrot.slane %v4066_v35, 2  ;;  %v694_v49 = vrot.slane %v4063_v34, 2 }
  0x1c   : > { %v520_v51 = vsel %vm505_vm1, %v517_v39, %v519_v42  ;;  %v690_v52 = vsel %vm682_vm2, %v688_v43, %v689_v44  ;;  %v696_v53 = vrot.slane %v459_v37, 2  ;;  %v354_v54 = vrot.slane %v286_v40, 7 }
  0x1d   : > { %3298 = vrot.lane.b32.xlu0 %v3297_v41, %s3968_s30  ;;  %v3307_v55 = vpack.i.bf16 %v520_v51, %v518_v46  ;;  %v692_v56 = vsel %vm682_vm2, %v689_v44, %v691_v47  ;;  %v695_v57 = vsel %vm682_vm2, %v693_v48, %v694_v49  ;;  %v355_v58 = vrot.slane %v287_v45, 7 }
  0x1e   : > { %v3312_v60 = vpack.i.bf16 %v692_v56, %v690_v52  ;;  %v697_v61 = vsel %vm682_vm2, %v694_v49, %v696_v53  ;;  %v4090_v62 = vsel %vm344_vm0, 0.0, %v354_v54  ;;  %v357_v63 = vrot.slane %v288_v50, 7 }
  0x1f   : > { %3308 = vrot.lane.b32.xlu1 %v3307_v55, %s3968_s30  ;;  %v3317_v0 = vpack.i.bf16 %v697_v61, %v695_v57  ;;  %v4094_v1 = vsel %vm344_vm0, %v354_v54, %v355_v58  ;;  %v460_v2 = vsel %vm344_vm0, %v355_v58, 0.0  ;;  %v521_v3 = vrot.slane %v4090_v62, 1 }
  0x20   : > { %v522_v4 = vrot.slane %v4094_v1, 1  ;;  %v524_v5 = vrot.slane %v460_v2, 1  ;;  %v358_v6 = vrot.slane %v289_v59, 7  ;;  %v4100_v7 = vsel %vm344_vm0, 0.0, %v357_v63 }
  0x21   : > { %3313 = vrot.lane.b32.xlu0 %v3312_v60, %s3969_s8  ;;  %v526_v8 = vrot.slane %v4100_v7, 1  ;;  %v698_v9 = vrot.slane %v4090_v62, 2  ;;  %v699_v10 = vrot.slane %v4094_v1, 2  ;;  %v701_v11 = vrot.slane %v460_v2, 2 }
  0x22   : > { %v523_v14 = vsel %vm505_vm1, %v521_v3, %v522_v4  ;;  %v525_v16 = vsel %vm505_vm1, %v522_v4, %v524_v5  ;;  %v4109_v17 = vsel %vm344_vm0, %v357_v63, %v358_v6  ;;  %v461_v18 = vsel %vm344_vm0, %v358_v6, 0.0  ;;  %v294_v63 = vld [vmem:[%s4029_s29 + $0x70] sm:$0xff]  ;;  %v296_v6 = vld [vmem:[%s4029_s29 + $0x80] sm:$0xff] }
  0x23   : > { %3318 = vrot.lane.b32.xlu1 %v3317_v0, %s3969_s8  ;;  %v3322_v20 = vpack.i.bf16 %v525_v16, %v523_v14  ;;  %v527_v21 = vrot.slane %v4109_v17, 1  ;;  %v529_v23 = vrot.slane %v461_v18, 1  ;;  %v700_v24 = vsel %vm682_vm2, %v698_v9, %v699_v10  ;;  %v295_v0 = vld [vmem:[%s4029_s29 + $0x78] sm:$0xff] }
  0x24   : > { %v702_v26 = vsel %vm682_vm2, %v699_v10, %v701_v11  ;;  %v703_v27 = vrot.slane %v4100_v7, 2  ;;  %v704_v28 = vrot.slane %v4109_v17, 2  ;;  %v706_v29 = vrot.slane %v461_v18, 2 }
  0x25   : > { %3323 = vrot.lane.b32.xlu0 %v3322_v20, %s3968_s30  ;;  %v528_v32 = vsel %vm505_vm1, %v526_v8, %v527_v21  ;;  %v530_v33 = vsel %vm505_vm1, %v527_v21, %v529_v23  ;;  %v3332_v36 = vpack.i.bf16 %v702_v26, %v700_v24  ;;  %v360_v37 = vrot.slane %v290_v19, 7  ;;  %v297_v8 = vld [vmem:[%s4029_s29 + $0x88] sm:$0xff] }
  0x26   : > { %v3327_v38 = vpack.i.bf16 %v530_v33, %v528_v32  ;;  %v705_v39 = vsel %vm682_vm2, %v703_v27, %v704_v28  ;;  %v707_v40 = vsel %vm682_vm2, %v704_v28, %v706_v29  ;;  %v361_v41 = vrot.slane %v291_v25, 7 }
  0x27   : > { %v3337_v42 = vpack.i.bf16 %v707_v40, %v705_v39  ;;  %v4128_v43 = vsel %vm344_vm0, 0.0, %v360_v37  ;;  %v363_v44 = vrot.slane %v292_v30, 7  ;;  %v364_v45 = vrot.slane %v293_v31, 7 }
  0x28   : > { %3328 = vrot.lane.b32.xlu1 %v3327_v38, %s3968_s30  ;;  %v4132_v46 = vsel %vm344_vm0, %v360_v37, %v361_v41  ;;  %v462_v47 = vsel %vm344_vm0, %v361_v41, 0.0  ;;  %v531_v48 = vrot.slane %v4128_v43, 1  ;;  %v708_v49 = vrot.slane %v4128_v43, 2 }
  0x29   : > { %3333 = vrot.lane.b32.xlu0 %v3332_v36, %s3969_s8  ;;  %v532_v50 = vrot.slane %v4132_v46, 1  ;;  %v534_v51 = vrot.slane %v462_v47, 1  ;;  %v4140_v52 = vsel %vm344_vm0, %v363_v44, %v364_v45  ;;  %v4143_v53 = vsel %vm344_vm0, 0.0, %v363_v44 }
  0x2a   : > { %v463_v54 = vsel %vm344_vm0, %v364_v45, 0.0  ;;  %v536_v55 = vrot.slane %v4143_v53, 1  ;;  %v537_v56 = vrot.slane %v4140_v52, 1  ;;  %v709_v57 = vrot.slane %v4132_v46, 2  ;;  %v298_v45 = vld [vmem:[%s4029_s29 + $0x90] sm:$0xff] }
  0x2b   : > { %v533_v58 = vsel %vm505_vm1, %v531_v48, %v532_v50  ;;  %v535_v59 = vsel %vm505_vm1, %v532_v50, %v534_v51  ;;  %v539_v60 = vrot.slane %v463_v54, 1  ;;  %v711_v61 = vrot.slane %v462_v47, 2  ;;  %v299_v51 = vld [vmem:[%s4029_s29 + $0x98] sm:$0xff] }
  0x2c   : > { %3338 = vrot.lane.b32.xlu1 %v3337_v42, %s3969_s8  ;;  %v3342_v2 = vpack.i.bf16 %v535_v59, %v533_v58  ;;  %v538_v3 = vsel %vm505_vm1, %v536_v55, %v537_v56  ;;  %v710_v4 = vsel %vm682_vm2, %v708_v49, %v709_v57  ;;  %v713_v5 = vrot.slane %v4143_v53, 2  ;;  %v300_v58 = vld [vmem:[%s4029_s29 + $0xa0] sm:$0xff]  ;;  %v301_v59 = vld [vmem:[%s4029_s29 + $0xa8] sm:$0xff] }
  0x2d   : > { %v540_v9 = vsel %vm505_vm1, %v537_v56, %v539_v60  ;;  %v712_v10 = vsel %vm682_vm2, %v709_v57, %v711_v61  ;;  %v714_v11 = vrot.slane %v4140_v52, 2  ;;  %v716_v14 = vrot.slane %v463_v54, 2 }
  0x2e   : > { %3343 = vrot.lane.b32.xlu0 %v3342_v2, %s3968_s30  ;;  %v3347_v16 = vpack.i.bf16 %v540_v9, %v538_v3  ;;  %v3352_v18 = vpack.i.bf16 %v712_v10, %v710_v4  ;;  %v366_v19 = vrot.slane %v294_v63, 7  ;;  %v367_v20 = vrot.slane %v295_v0, 7 }
  0x2f   : > { %v715_v21 = vsel %vm682_vm2, %v713_v5, %v714_v11  ;;  %v717_v23 = vsel %vm682_vm2, %v714_v11, %v716_v14  ;;  %v369_v24 = vrot.slane %v296_v6, 7  ;;  %v370_v25 = vrot.slane %v297_v8, 7 }
  0x30   : > { %3348 = vrot.lane.b32.xlu1 %v3347_v16, %s3968_s30  ;;  %v3357_v26 = vpack.i.bf16 %v717_v23, %v715_v21  ;;  %v4167_v27 = vsel %vm344_vm0, %v366_v19, %v367_v20  ;;  %v4170_v28 = vsel %vm344_vm0, 0.0, %v366_v19  ;;  %v464_v29 = vsel %vm344_vm0, %v367_v20, 0.0 }
  0x31   : > { %v541_v30 = vrot.slane %v4170_v28, 1  ;;  %v542_v31 = vrot.slane %v4167_v27, 1  ;;  %v544_v32 = vrot.slane %v464_v29, 1  ;;  %v4176_v33 = vsel %vm344_vm0, %v369_v24, %v370_v25 }
  0x32   : > { %3353 = vrot.lane.b32.xlu0 %v3352_v18, %s3969_s8  ;;  %v4180_v36 = vsel %vm344_vm0, 0.0, %v369_v24  ;;  %v465_v37 = vsel %vm344_vm0, %v370_v25, 0.0  ;;  %v547_v38 = vrot.slane %v4176_v33, 1  ;;  %v718_v39 = vrot.slane %v4170_v28, 2 }
  0x33   : > { %v543_v40 = vsel %vm505_vm1, %v541_v30, %v542_v31  ;;  %v545_v41 = vsel %vm505_vm1, %v542_v31, %v544_v32  ;;  %v546_v42 = vrot.slane %v4180_v36, 1  ;;  %v549_v44 = vrot.slane %v465_v37, 1 }
  0x34   : > { %3358 = vrot.lane.b32.xlu1 %v3357_v26, %s3969_s8  ;;  %v3362_v47 = vpack.i.bf16 %v545_v41, %v543_v40  ;;  %v719_v48 = vrot.slane %v4167_v27, 2  ;;  %v721_v49 = vrot.slane %v464_v29, 2  ;;  %v723_v50 = vrot.slane %v4180_v36, 2 }
  0x35   : > { %v548_v54 = vsel %vm505_vm1, %v546_v42, %v547_v38  ;;  %v550_v55 = vsel %vm505_vm1, %v547_v38, %v549_v44  ;;  %v724_v56 = vrot.slane %v4176_v33, 2  ;;  %v726_v57 = vrot.slane %v465_v37, 2  ;;  %v302_v38 = vld [vmem:[%s4029_s29 + $0xb0] sm:$0xff] }
  0x36   : > { %3363 = vrot.lane.b32.xlu0 %v3362_v47, %s3968_s30  ;;  %v3367_v60 = vpack.i.bf16 %v550_v55, %v548_v54  ;;  %v720_v61 = vsel %vm682_vm2, %v718_v39, %v719_v48  ;;  %v722_v63 = vsel %vm682_vm2, %v719_v48, %v721_v49  ;;  %v372_v0 = vrot.slane %v298_v45, 7  ;;  %v303_v39 = vld [vmem:[%s4029_s29 + $0xb8] sm:$0xff]  ;;  %v304_v45 = vld [vmem:[%s4029_s29 + $0xc0] sm:$0xff]  ;;  %v305_v47 = vld [vmem:[%s4029_s29 + $0xc8] sm:$0xff] }
  0x37   : > { %v3372_v2 = vpack.i.bf16 %v722_v63, %v720_v61  ;;  %v725_v3 = vsel %vm682_vm2, %v723_v50, %v724_v56  ;;  %v727_v4 = vsel %vm682_vm2, %v724_v56, %v726_v57  ;;  %v373_v5 = vrot.slane %v299_v51, 7 }
  0x38   : > { %3368 = vrot.lane.b32.xlu1 %v3367_v60, %s3968_s30  ;;  %v3377_v6 = vpack.i.bf16 %v727_v4, %v725_v3  ;;  %v4205_v8 = vsel %vm344_vm0, 0.0, %v372_v0  ;;  %v375_v9 = vrot.slane %v300_v58, 7  ;;  %v376_v10 = vrot.slane %v301_v59, 7 }
  0x39   : > { %v4208_v11 = vsel %vm344_vm0, %v372_v0, %v373_v5  ;;  %v466_v14 = vsel %vm344_vm0, %v373_v5, 0.0  ;;  %v551_v16 = vrot.slane %v4205_v8, 1  ;;  %v728_v18 = vrot.slane %v4205_v8, 2 }
  0x3a   : > { %3373 = vrot.lane.b32.xlu0 %v3372_v2, %s3969_s8  ;;  %v552_v19 = vrot.slane %v4208_v11, 1  ;;  %v554_v20 = vrot.slane %v466_v14, 1  ;;  %v4216_v21 = vsel %vm344_vm0, %v375_v9, %v376_v10  ;;  %v4219_v23 = vsel %vm344_vm0, 0.0, %v375_v9 }
  0x3b   : > { %v467_v24 = vsel %vm344_vm0, %v376_v10, 0.0  ;;  %v556_v25 = vrot.slane %v4219_v23, 1  ;;  %v557_v26 = vrot.slane %v4216_v21, 1  ;;  %v729_v29 = vrot.slane %v4208_v11, 2 }
  0x3c   : > { %3378 = vrot.lane.b32.xlu1 %v3377_v6, %s3969_s8  ;;  %v553_v30 = vsel %vm505_vm1, %v551_v16, %v552_v19  ;;  %v555_v31 = vsel %vm505_vm1, %v552_v19, %v554_v20  ;;  %v559_v32 = vrot.slane %v467_v24, 1  ;;  %v731_v37 = vrot.slane %v466_v14, 2 }
  0x3d   : > { %v3382_v40 = vpack.i.bf16 %v555_v31, %v553_v30  ;;  %v558_v41 = vsel %vm505_vm1, %v556_v25, %v557_v26  ;;  %v730_v42 = vsel %vm682_vm2, %v728_v18, %v729_v29  ;;  %v733_v44 = vrot.slane %v4219_v23, 2 }
  0x3e   : > { %v560_v48 = vsel %vm505_vm1, %v557_v26, %v559_v32  ;;  %v732_v49 = vsel %vm682_vm2, %v729_v29, %v731_v37  ;;  %v734_v50 = vrot.slane %v4216_v21, 2  ;;  %v736_v51 = vrot.slane %v467_v24, 2  ;;  %v306_v26 = vld [vmem:[%s4029_s29 + $0xd0] sm:$0xff]  ;;  %v307_v37 = vld [vmem:[%s4029_s29 + $0xd8] sm:$0xff] }
  0x3f   : > { %3383 = vrot.lane.b32.xlu0 %v3382_v40, %s3968_s30  ;;  %v3387_v54 = vpack.i.bf16 %v560_v48, %v558_v41  ;;  %v3392_v55 = vpack.i.bf16 %v732_v49, %v730_v42  ;;  %v378_v56 = vrot.slane %v302_v38, 7  ;;  %v379_v57 = vrot.slane %v303_v39, 7  ;;  %v308_v42 = vld [vmem:[%s4029_s29 + $0xe0] sm:$0xff] }
  0x40   : > { %v735_v58 = vsel %vm682_vm2, %v733_v44, %v734_v50  ;;  %v737_v59 = vsel %vm682_vm2, %v734_v50, %v736_v51  ;;  %v381_v60 = vrot.slane %v304_v45, 7  ;;  %v382_v61 = vrot.slane %v305_v47, 7  ;;  %v309_v44 = vld [vmem:[%s4029_s29 + $0xe8] sm:$0xff] }
  0x41   : > { %3388 = vrot.lane.b32.xlu1 %v3387_v54, %s3968_s30  ;;  %v3397_v63 = vpack.i.bf16 %v737_v59, %v735_v58  ;;  %v4243_v0 = vsel %vm344_vm0, %v378_v56, %v379_v57  ;;  %v4246_v2 = vsel %vm344_vm0, 0.0, %v378_v56  ;;  %v468_v3 = vsel %vm344_vm0, %v379_v57, 0.0 }
  0x42   : > { %v561_v4 = vrot.slane %v4246_v2, 1  ;;  %v562_v5 = vrot.slane %v4243_v0, 1  ;;  %v564_v6 = vrot.slane %v468_v3, 1  ;;  %v4252_v9 = vsel %vm344_vm0, %v381_v60, %v382_v61 }
  0x43   : > { %3393 = vrot.lane.b32.xlu0 %v3392_v55, %s3969_s8  ;;  %v4256_v10 = vsel %vm344_vm0, 0.0, %v381_v60  ;;  %v469_v14 = vsel %vm344_vm0, %v382_v61, 0.0  ;;  %v567_v16 = vrot.slane %v4252_v9, 1  ;;  %v738_v18 = vrot.slane %v4246_v2, 2 }
  0x44   : > { %v563_v19 = vsel %vm505_vm1, %v561_v4, %v562_v5  ;;  %v565_v20 = vsel %vm505_vm1, %v562_v5, %v564_v6  ;;  %v566_v24 = vrot.slane %v4256_v10, 1  ;;  %v569_v25 = vrot.slane %v469_v14, 1 }
  0x45   : > { %3398 = vrot.lane.b32.xlu1 %v3397_v63, %s3969_s8  ;;  %v3402_v29 = vpack.i.bf16 %v565_v20, %v563_v19  ;;  %v739_v30 = vrot.slane %v4243_v0, 2  ;;  %v741_v31 = vrot.slane %v468_v3, 2  ;;  %v743_v32 = vrot.slane %v4256_v10, 2 }
  0x46   : > { %v568_v38 = vsel %vm505_vm1, %v566_v24, %v567_v16  ;;  %v570_v39 = vsel %vm505_vm1, %v567_v16, %v569_v25  ;;  %v744_v40 = vrot.slane %v4252_v9, 2  ;;  %v746_v41 = vrot.slane %v469_v14, 2 }
  0x47   : > { %3403 = vrot.lane.b32.xlu0 %v3402_v29, %s3968_s30  ;;  %v3407_v45 = vpack.i.bf16 %v570_v39, %v568_v38  ;;  %v740_v47 = vsel %vm682_vm2, %v738_v18, %v739_v30  ;;  %v742_v48 = vsel %vm682_vm2, %v739_v30, %v741_v31  ;;  %v384_v49 = vrot.slane %v306_v26, 7  ;;  %v310_v30 = vld [vmem:[%s4029_s29 + $0xf0] sm:$0xff]  ;;  %v311_v31 = vld [vmem:[%s4029_s29 + $0xf8] sm:$0xff] }
  0x48   : > { %v3412_v50 = vpack.i.bf16 %v742_v48, %v740_v47  ;;  %v745_v51 = vsel %vm682_vm2, %v743_v32, %v744_v40  ;;  %v747_v54 = vsel %vm682_vm2, %v744_v40, %v746_v41  ;;  %v385_v55 = vrot.slane %v307_v37, 7 }
  0x49   : > { %3408 = vrot.lane.b32.xlu1 %v3407_v45, %s3968_s30  ;;  %v3417_v56 = vpack.i.bf16 %v747_v54, %v745_v51  ;;  %v4281_v57 = vsel %vm344_vm0, 0.0, %v384_v49  ;;  %v387_v58 = vrot.slane %v308_v42, 7  ;;  %v388_v59 = vrot.slane %v309_v44, 7 }
  0x4a   : > { %v4284_v60 = vsel %vm344_vm0, %v384_v49, %v385_v55  ;;  %v470_v61 = vsel %vm344_vm0, %v385_v55, 0.0  ;;  %v571_v63 = vrot.slane %v4281_v57, 1  ;;  %v748_v3 = vrot.slane %v4281_v57, 2 }
  0x4b   : > { %3413 = vrot.lane.b32.xlu0 %v3412_v50, %s3969_s8  ;;  %v572_v4 = vrot.slane %v4284_v60, 1  ;;  %v574_v5 = vrot.slane %v470_v61, 1  ;;  %v4292_v6 = vsel %vm344_vm0, %v387_v58, %v388_v59  ;;  %v4295_v14 = vsel %vm344_vm0, 0.0, %v387_v58 }
  0x4c   : > { %v471_v16 = vsel %vm344_vm0, %v388_v59, 0.0  ;;  %v576_v18 = vrot.slane %v4295_v14, 1  ;;  %v577_v19 = vrot.slane %v4292_v6, 1  ;;  %v749_v20 = vrot.slane %v4284_v60, 2 }
  0x4d   : > { %3418 = vrot.lane.b32.xlu1 %v3417_v56, %s3969_s8  ;;  %v573_v24 = vsel %vm505_vm1, %v571_v63, %v572_v4  ;;  %v575_v25 = vsel %vm505_vm1, %v572_v4, %v574_v5  ;;  %v579_v26 = vrot.slane %v471_v16, 1  ;;  %v751_v29 = vrot.slane %v470_v61, 2 }
  0x4e   : > { %v3422_v32 = vpack.i.bf16 %v575_v25, %v573_v24  ;;  %v578_v37 = vsel %vm505_vm1, %v576_v18, %v577_v19  ;;  %v750_v38 = vsel %vm682_vm2, %v748_v3, %v749_v20  ;;  %v753_v39 = vrot.slane %v4295_v14, 2 }
  0x4f   : > { %v580_v40 = vsel %vm505_vm1, %v577_v19, %v579_v26  ;;  %v752_v41 = vsel %vm682_vm2, %v749_v20, %v751_v29  ;;  %v754_v42 = vrot.slane %v4292_v6, 2  ;;  %v756_v44 = vrot.slane %v471_v16, 2  ;;  %v3922_v26 = vld [vmem:[%s5580_s1] sm:$0xff]  }
  0x50   : > { %3423 = vrot.lane.b32.xlu0 %v3422_v32, %s3968_s30  ;;  %v3427_v45 = vpack.i.bf16 %v580_v40, %v578_v37  ;;  %v3432_v47 = vpack.i.bf16 %v752_v41, %v750_v38  ;;  %v390_v48 = vrot.slane %v310_v30, 7  ;;  %v391_v49 = vrot.slane %v311_v31, 7  ;;  %3159 = vmatprep.subr.bf16.mxu0 %v3922_v26  ;;  %v3923_v41 = vld [vmem:[%s5580_s1 + $0x8] sm:$0xff]  }
  0x51   : > { %v755_v50 = vsel %vm682_vm2, %v753_v39, %v754_v42  ;;  %v757_v51 = vsel %vm682_vm2, %v754_v42, %v756_v44  ;;  %3269 = vmatprep.subr.bf16.mxu1 %v3922_v26  ;;  %3160 = vmatpush3.bf16.msra.mxu0 %v3922_v26 }
  0x52   : > { %3428 = vrot.lane.b32.xlu1 %v3427_v45, %s3968_s30  ;;  %v3437_v54 = vpack.i.bf16 %v757_v51, %v755_v50  ;;  %v4317_v55 = vsel %vm344_vm0, %v390_v48, %v391_v49  ;;  %v4320_v56 = vsel %vm344_vm0, 0.0, %v390_v48  ;;  %v472_v58 = vsel %vm344_vm0, %v391_v49, 0.0  ;;  %3272 = vmatpush3.bf16.msra.mxu1 %v3922_v26 }
  0x53   : > { %v581_v59 = vrot.slane %v4320_v56, 1  ;;  %v582_v61 = vrot.slane %v4317_v55, 1  ;;  %v584_v63 = vrot.slane %v472_v58, 1  ;;  %v758_v3 = vrot.slane %v4320_v56, 2  ;;  %3161 = vmatprep.subr.bf16.mxu0 %v3923_v41  ;;  %3270 = vmatprep.subr.bf16.mxu1 %v3923_v41 }
  0x54   : > { %3433 = vrot.lane.b32.xlu0 %v3432_v47, %s3969_s8  ;;  %v759_v4 = vrot.slane %v4317_v55, 2  ;;  %v761_v5 = vrot.slane %v472_v58, 2 }
  0x55   : > { %v583_v16 = vsel %vm505_vm1, %v581_v59, %v582_v61  ;;  %v585_v18 = vsel %vm505_vm1, %v582_v61, %v584_v63  ;;  %3162 = vmatpush3.bf16.msra.mxu0 %v3923_v41 }
  0x56   : > { %3438 = vrot.lane.b32.xlu1 %v3437_v54, %s3969_s8  ;;  %v3442_v19 = vpack.i.bf16 %v585_v18, %v583_v16  ;;  %v760_v20 = vsel %vm682_vm2, %v758_v3, %v759_v4  ;;  %v762_v24 = vsel %vm682_vm2, %v759_v4, %v761_v5  ;;  %3273 = vmatpush3.bf16.msra.mxu1 %v3923_v41  ;;  %v3924_v54 = vld [vmem:[%s5580_s1 + $0x10] ss:$0 sps:$4 sm:$0x33]  }
  0x57   : > { %v3447_v25 = vpack.i.bf16 %v762_v24, %v760_v20  ;;  %3275 = vmatprep.subr.msk.bf16.mxu0 %vm1305_vm5, %v3924_v54  ;;  %v1307_v16 = vsel %vm1305_vm5, %v3924_v54, 0  ;;  %3276 = vmatprep.subr.msk.bf16.mxu1 %vm1305_vm5, %v3924_v54 }
  0x58   : > { %3443 = vrot.lane.b32.xlu0 %v3442_v19, %s3968_s30 }
  0x59   : > { %3164 = vmatpush3.bf16.msra.mxu0 %v1307_v16 }
  0x5a   : > { %3448 = vrot.lane.b32.xlu1 %v3447_v25, %s3969_s8  ;;  %3274 = vmatpush3.bf16.msra.mxu1 %v1307_v16 }
  0x8b   : > { %v3294_v29 = vpop.permute.xlu0 %3293 }
  0x8c   : > { %v3296_v30 = vunpack.i.h.bf16 %v3294_v29  ;;  %v3295_v31 = vunpack.i.l.bf16 %v3294_v29  ;;  %v3304_v32 = vpop.permute.xlu1 %3303 }
  0x8d   : > { %v3306_v37 = vunpack.i.h.bf16 %v3304_v32  ;;  %v3305_v38 = vunpack.i.l.bf16 %v3304_v32 }
  0x8e   : > { %v860_v39 = vsel %vm859_vm3, %v4041_v13, %v3295_v31  ;;  %v861_v40 = vsel %vm859_vm3, %v4038_v12, %v3296_v30 }
  0x8f   : > { %v3299_v42 = vpop.permute.xlu0 %3298  ;;  %v4346_v44 = vsel %vm892_vm4, %v860_v39, %v3305_v38  ;;  %v4349_v45 = vsel %vm892_vm4, %v861_v40, %v3306_v37 }
  0x90   : > { %v3301_v47 = vunpack.i.h.bf16 %v3299_v42  ;;  %v3452_v48 = vpack.i.bf16 %v4349_v45, %v4346_v44  ;;  %v3300_v13 = vunpack.i.l.bf16 %v3299_v42 }
  0x91   : > { %v3309_v49 = vpop.permute.xlu1 %3308 }
  0x92   : > { %v3311_v12 = vunpack.i.h.bf16 %v3309_v49  ;;  %v3310_v50 = vunpack.i.l.bf16 %v3309_v49  ;;  %3453 = vrot.lane.b32.xlu0 %v3452_v48, %s3970_s13  ;;  %v863_v58 = vsel %vm859_vm3, %v4052_v22, %v3301_v47  ;;  %v862_v63 = vsel %vm859_vm3, %v4045_v15, %v3300_v13 }
  0x93   : > { %v3314_v51 = vpop.permute.xlu0 %3313 }
  0x94   : > { %v3316_v59 = vunpack.i.h.bf16 %v3314_v51  ;;  %v3315_v61 = vunpack.i.l.bf16 %v3314_v51  ;;  %v865_v3 = vsel %vm859_vm3, %v4063_v34, %v3311_v12  ;;  %v864_v4 = vsel %vm859_vm3, %v4066_v35, %v3310_v50 }
  0x95   : > { %v3319_v5 = vpop.permute.xlu1 %3318 }
  0x96   : > { %v3321_v18 = vunpack.i.h.bf16 %v3319_v5  ;;  %v3320_v22 = vunpack.i.l.bf16 %v3319_v5  ;;  %v4369_v19 = vsel %vm892_vm4, %v862_v63, %v3315_v61  ;;  %v4372_v15 = vsel %vm892_vm4, %v863_v58, %v3316_v59 }
  0x97   : > { %v3324_v34 = vpop.permute.xlu0 %3323  ;;  %v3457_v35 = vpack.i.bf16 %v4372_v15, %v4369_v19 }
  0x98   : > { %v4377_v20 = vsel %vm892_vm4, %v864_v4, %v3320_v22  ;;  %v4380_v24 = vsel %vm892_vm4, %v865_v3, %v3321_v18  ;;  %v3326_v25 = vunpack.i.h.bf16 %v3324_v34  ;;  %v3325_v26 = vunpack.i.l.bf16 %v3324_v34 }
  0x99   : > { %3458 = vrot.lane.b32.xlu1 %v3457_v35, %s3970_s13  ;;  %3463 = vrot.lane.b32.xlu0 %v3457_v35, %s3971_s16  ;;  %v3467_v37 = vpack.i.bf16 %v4380_v24, %v4377_v20 }
  0x9a   : > { %v3329_v29 = vpop.permute.xlu1 %3328  ;;  %v867_v40 = vsel %vm859_vm3, %v4094_v1, %v3326_v25  ;;  %v866_v41 = vsel %vm859_vm3, %v4090_v62, %v3325_v26 }
  0x9b   : > { %v3331_v30 = vunpack.i.h.bf16 %v3329_v29  ;;  %v3330_v31 = vunpack.i.l.bf16 %v3329_v29  ;;  %v3334_v32 = vpop.permute.xlu0 %3333 }
  0x9c   : > { %v3336_v38 = vunpack.i.h.bf16 %v3334_v32  ;;  %v3335_v39 = vunpack.i.l.bf16 %v3334_v32 }
  0x9d   : > { %3468 = vrot.lane.b32.xlu1 %v3467_v37, %s3971_s16  ;;  %3473 = vrot.lane.b32.xlu0 %v3467_v37, %s3970_s13  ;;  %v869_v42 = vsel %vm859_vm3, %v4109_v17, %v3331_v30  ;;  %v868_v47 = vsel %vm859_vm3, %v4100_v7, %v3330_v31 }
  0x9e   : > { %v3339_v48 = vpop.permute.xlu1 %3338  ;;  %v4397_v13 = vsel %vm892_vm4, %v866_v41, %v3335_v39  ;;  %v4400_v49 = vsel %vm892_vm4, %v867_v40, %v3336_v38 }
  0x9f   : > { %v3341_v1 = vunpack.i.h.bf16 %v3339_v48  ;;  %v3340_v12 = vunpack.i.l.bf16 %v3339_v48  ;;  %v3477_v62 = vpack.i.bf16 %v4400_v49, %v4397_v13 }
  0xa0   : > { %v3344_v50 = vpop.permute.xlu0 %3343 }
  0xa1   : > { %3478 = vrot.lane.b32.xlu1 %v3477_v62, %s3970_s13  ;;  %3483 = vrot.lane.b32.xlu0 %v3477_v62, %s3971_s16  ;;  %v4407_v17 = vsel %vm892_vm4, %v868_v47, %v3340_v12  ;;  %v4410_v7 = vsel %vm892_vm4, %v869_v42, %v3341_v1  ;;  %v3346_v51 = vunpack.i.h.bf16 %v3344_v50  ;;  %v3345_v54 = vunpack.i.l.bf16 %v3344_v50 }
  0xa2   : > { %v3349_v58 = vpop.permute.xlu1 %3348  ;;  %v3487_v63 = vpack.i.bf16 %v4410_v7, %v4407_v17 }
  0xa3   : > { %v3351_v59 = vunpack.i.h.bf16 %v3349_v58  ;;  %v3350_v61 = vunpack.i.l.bf16 %v3349_v58  ;;  %v871_v16 = vsel %vm859_vm3, %v4132_v46, %v3346_v51  ;;  %v870_v18 = vsel %vm859_vm3, %v4128_v43, %v3345_v54 }
  0xa4   : > { %v3354_v3 = vpop.permute.xlu0 %3353 }
  0xa5   : > { %v3356_v4 = vunpack.i.h.bf16 %v3354_v3  ;;  %v3355_v5 = vunpack.i.l.bf16 %v3354_v3  ;;  %3488 = vrot.lane.b32.xlu1 %v3487_v63, %s3971_s16  ;;  %3493 = vrot.lane.b32.xlu0 %v3487_v63, %s3970_s13  ;;  %v873_v22 = vsel %vm859_vm3, %v4140_v52, %v3351_v59  ;;  %v872_v34 = vsel %vm859_vm3, %v4143_v53, %v3350_v61 }
  0xa6   : > { %v3359_v35 = vpop.permute.xlu1 %3358 }
  0xa7   : > { %v3361_v25 = vunpack.i.h.bf16 %v3359_v35  ;;  %v3360_v26 = vunpack.i.l.bf16 %v3359_v35  ;;  %v4425_v29 = vsel %vm892_vm4, %v870_v18, %v3355_v5  ;;  %v4428_v30 = vsel %vm892_vm4, %v871_v16, %v3356_v4 }
  0xa8   : > { %v3364_v31 = vpop.permute.xlu0 %3363  ;;  %v3497_v46 = vpack.i.bf16 %v4428_v30, %v4425_v29 }
  0xa9   : > { %v3366_v43 = vunpack.i.h.bf16 %v3364_v31  ;;  %v4433_v32 = vsel %vm892_vm4, %v872_v34, %v3360_v26  ;;  %v4436_v52 = vsel %vm892_vm4, %v873_v22, %v3361_v25  ;;  %v3365_v53 = vunpack.i.l.bf16 %v3364_v31 }
  0xaa   : > { %v3369_v37 = vpop.permute.xlu1 %3368  ;;  %3498 = vrot.lane.b32.xlu1 %v3497_v46, %s3970_s13  ;;  %3503 = vrot.lane.b32.xlu0 %v3497_v46, %s3971_s16  ;;  %v3507_v41 = vpack.i.bf16 %v4436_v52, %v4433_v32 }
  0xab   : > { %v3371_v38 = vunpack.i.h.bf16 %v3369_v37  ;;  %v3370_v39 = vunpack.i.l.bf16 %v3369_v37  ;;  %v875_v42 = vsel %vm859_vm3, %v4167_v27, %v3366_v43  ;;  %v874_v1 = vsel %vm859_vm3, %v4170_v28, %v3365_v53 }
  0xac   : > { %v3374_v40 = vpop.permute.xlu0 %3373 }
  0xad   : > { %v3376_v47 = vunpack.i.h.bf16 %v3374_v40  ;;  %v3375_v48 = vunpack.i.l.bf16 %v3374_v40  ;;  %v877_v12 = vsel %vm859_vm3, %v4176_v33, %v3371_v38  ;;  %v876_v62 = vsel %vm859_vm3, %v4180_v36, %v3370_v39 }
  0xae   : > { %v3379_v50 = vpop.permute.xlu1 %3378  ;;  %3508 = vrot.lane.b32.xlu1 %v3507_v41, %s3971_s16  ;;  %3513 = vrot.lane.b32.xlu0 %v3507_v41, %s3970_s13 }
  0xaf   : > { %v3381_v51 = vunpack.i.h.bf16 %v3379_v50  ;;  %v3380_v54 = vunpack.i.l.bf16 %v3379_v50  ;;  %v4453_v27 = vsel %vm892_vm4, %v874_v1, %v3375_v48  ;;  %v4456_v58 = vsel %vm892_vm4, %v875_v42, %v3376_v47 }
  0xb0   : > { %v3517_v28 = vpack.i.bf16 %v4456_v58, %v4453_v27 }
  0xb1   : > { %v3384_v33 = vpop.permute.xlu0 %3383  ;;  %v4461_v59 = vsel %vm892_vm4, %v876_v62, %v3380_v54  ;;  %v4464_v36 = vsel %vm892_vm4, %v877_v12, %v3381_v51 }
  0xb2   : > { %3518 = vrot.lane.b32.xlu1 %v3517_v28, %s3970_s13  ;;  %3523 = vrot.lane.b32.xlu0 %v3517_v28, %s3971_s16  ;;  %v3386_v61 = vunpack.i.h.bf16 %v3384_v33  ;;  %v3385_v63 = vunpack.i.l.bf16 %v3384_v33  ;;  %v3527_v16 = vpack.i.bf16 %v4464_v36, %v4461_v59 }
  0xb3   : > { %v3389_v3 = vpop.permute.xlu1 %3388 }
  0xb4   : > { %v3391_v4 = vunpack.i.h.bf16 %v3389_v3  ;;  %v3390_v5 = vunpack.i.l.bf16 %v3389_v3  ;;  %v879_v35 = vsel %vm859_vm3, %v4208_v11, %v3386_v61  ;;  %v878_v25 = vsel %vm859_vm3, %v4205_v8, %v3385_v63 }
  0xb5   : > { %v3394_v18 = vpop.permute.xlu0 %3393 }
  0xb6   : > { %v3396_v22 = vunpack.i.h.bf16 %v3394_v18  ;;  %v3395_v34 = vunpack.i.l.bf16 %v3394_v18  ;;  %3528 = vrot.lane.b32.xlu1 %v3527_v16, %s3971_s16  ;;  %3533 = vrot.lane.b32.xlu0 %v3527_v16, %s3970_s13  ;;  %v881_v26 = vsel %vm859_vm3, %v4216_v21, %v3391_v4  ;;  %v880_v31 = vsel %vm859_vm3, %v4219_v23, %v3390_v5 }
  0xb7   : > { %v3399_v46 = vpop.permute.xlu1 %3398 }
  0xb8   : > { %v3401_v43 = vunpack.i.h.bf16 %v3399_v46  ;;  %v3400_v53 = vunpack.i.l.bf16 %v3399_v46  ;;  %v4481_v37 = vsel %vm892_vm4, %v878_v25, %v3395_v34  ;;  %v4484_v38 = vsel %vm892_vm4, %v879_v35, %v3396_v22 }
  0xb9   : > { %v3404_v39 = vpop.permute.xlu0 %3403  ;;  %v3537_v11 = vpack.i.bf16 %v4484_v38, %v4481_v37 }
  0xba   : > { %v3406_v8 = vunpack.i.h.bf16 %v3404_v39  ;;  %v4489_v40 = vsel %vm892_vm4, %v880_v31, %v3400_v53  ;;  %v4492_v21 = vsel %vm892_vm4, %v881_v26, %v3401_v43  ;;  %v3405_v23 = vunpack.i.l.bf16 %v3404_v39 }
  0xbb   : > { %v3409_v41 = vpop.permute.xlu1 %3408  ;;  %3538 = vrot.lane.b32.xlu1 %v3537_v11, %s3970_s13  ;;  %3543 = vrot.lane.b32.xlu0 %v3537_v11, %s3971_s16  ;;  %v3547_v1 = vpack.i.bf16 %v4492_v21, %v4489_v40 }
  0xbc   : > { %v3411_v42 = vunpack.i.h.bf16 %v3409_v41  ;;  %v3410_v47 = vunpack.i.l.bf16 %v3409_v41  ;;  %v883_v12 = vsel %vm859_vm3, %v4243_v0, %v3406_v8  ;;  %v882_v51 = vsel %vm859_vm3, %v4246_v2, %v3405_v23 }
  0xbd   : > { %v3414_v48 = vpop.permute.xlu0 %3413 }
  0xbe   : > { %v3416_v62 = vunpack.i.h.bf16 %v3414_v48  ;;  %v3415_v50 = vunpack.i.l.bf16 %v3414_v48  ;;  %v885_v54 = vsel %vm859_vm3, %v4252_v9, %v3411_v42  ;;  %v884_v28 = vsel %vm859_vm3, %v4256_v10, %v3410_v47 }
  0xbf   : > { %v3419_v33 = vpop.permute.xlu1 %3418  ;;  %3548 = vrot.lane.b32.xlu1 %v3547_v1, %s3971_s16  ;;  %3553 = vrot.lane.b32.xlu0 %v3547_v1, %s3970_s13 }
  0xc0   : > { %v3421_v61 = vunpack.i.h.bf16 %v3419_v33  ;;  %v3420_v63 = vunpack.i.l.bf16 %v3419_v33  ;;  %v4509_v0 = vsel %vm892_vm4, %v882_v51, %v3415_v50  ;;  %v4512_v3 = vsel %vm892_vm4, %v883_v12, %v3416_v62 }
  0xc1   : > { %v3557_v2 = vpack.i.bf16 %v4512_v3, %v4509_v0 }
  0xc2   : > { %v3424_v9 = vpop.permute.xlu0 %3423  ;;  %v4517_v4 = vsel %vm892_vm4, %v884_v28, %v3420_v63  ;;  %v4520_v10 = vsel %vm892_vm4, %v885_v54, %v3421_v61 }
  0xc3   : > { %3558 = vrot.lane.b32.xlu1 %v3557_v2, %s3970_s13  ;;  %3563 = vrot.lane.b32.xlu0 %v3557_v2, %s3971_s16  ;;  %v3426_v5 = vunpack.i.h.bf16 %v3424_v9  ;;  %v3425_v16 = vunpack.i.l.bf16 %v3424_v9  ;;  %v3567_v35 = vpack.i.bf16 %v4520_v10, %v4517_v4 }
  0xc4   : > { %v3429_v18 = vpop.permute.xlu1 %3428 }
  0xc5   : > { %v3431_v22 = vunpack.i.h.bf16 %v3429_v18  ;;  %v3430_v34 = vunpack.i.l.bf16 %v3429_v18  ;;  %v887_v46 = vsel %vm859_vm3, %v4284_v60, %v3426_v5  ;;  %v886_v43 = vsel %vm859_vm3, %v4281_v57, %v3425_v16 }
  0xc6   : > { %v3434_v25 = vpop.permute.xlu0 %3433 }
  0xc7   : > { %v3436_v26 = vunpack.i.h.bf16 %v3434_v25  ;;  %v3435_v31 = vunpack.i.l.bf16 %v3434_v25  ;;  %3568 = vrot.lane.b32.xlu1 %v3567_v35, %s3971_s16  ;;  %3573 = vrot.lane.b32.xlu0 %v3567_v35, %s3970_s13  ;;  %v889_v53 = vsel %vm859_vm3, %v4292_v6, %v3431_v22  ;;  %v888_v39 = vsel %vm859_vm3, %v4295_v14, %v3430_v34 }
  0xc8   : > { %v3439_v11 = vpop.permute.xlu1 %3438 }
  0xc9   : > { %v3441_v8 = vunpack.i.h.bf16 %v3439_v11  ;;  %v3440_v23 = vunpack.i.l.bf16 %v3439_v11  ;;  %v4537_v41 = vsel %vm892_vm4, %v886_v43, %v3435_v31  ;;  %v4540_v42 = vsel %vm892_vm4, %v887_v46, %v3436_v26 }
  0xca   : > { %v3577_v60 = vpack.i.bf16 %v4540_v42, %v4537_v41  ;;  %v3444_v47 = vpop.permute.xlu0 %3443 }
  0xcb   : > { %v3446_v57 = vunpack.i.h.bf16 %v3444_v47  ;;  %v3445_v48 = vunpack.i.l.bf16 %v3444_v47  ;;  %v4545_v6 = vsel %vm892_vm4, %v888_v39, %v3440_v23  ;;  %v4548_v14 = vsel %vm892_vm4, %v889_v53, %v3441_v8 }
  0xcc   : > { %3578 = vrot.lane.b32.xlu1 %v3577_v60, %s3970_s13  ;;  %3583 = vrot.lane.b32.xlu0 %v3577_v60, %s3971_s16  ;;  %v3449_v1 = vpop.permute.xlu1 %3448  ;;  %v3587_v54 = vpack.i.bf16 %v4548_v14, %v4545_v6 }
  0xcd   : > { %v891_v12 = vsel %vm859_vm3, %v4317_v55, %v3446_v57  ;;  %v890_v62 = vsel %vm859_vm3, %v4320_v56, %v3445_v48  ;;  %v3451_v50 = vunpack.i.h.bf16 %v3449_v1  ;;  %v3450_v51 = vunpack.i.l.bf16 %v3449_v1 }
  0xce   : > { %v3972_v55 = vmov 0.0  }
  0xcf   : > { %v923_v28 = vsel %vm892_vm4, %v890_v62, %v3450_v51  ;;  %v924_v33 = vsel %vm892_vm4, %v891_v12, %v3451_v50 }
  0xd0   : > { %3588 = vrot.lane.b32.xlu1 %v3587_v54, %s3971_s16  ;;  %3593 = vrot.lane.b32.xlu0 %v3587_v54, %s3970_s13  ;;  %v3597_v61 = vpack.i.bf16 %v924_v33, %v923_v28 }
  0xd4   : > { %3598 = vrot.lane.b32.xlu1 %v3597_v61, %s3970_s13  ;;  %3603 = vrot.lane.b32.xlu0 %v3597_v61, %s3971_s16 }
  0xd8   : > { %1114 = vrot.lane.b32.xlu1 %v3972_v55, %s3971_s16 }
 0x104   : > { %v3454_v56 = vpop.permute.xlu0 %3453 }
 0x105   : > { %v3456_v63 = vunpack.i.h.bf16 %v3454_v56  ;;  %v3455_v2 = vunpack.i.l.bf16 %v3454_v56 }
 0x107   : > { %v1149_v22 = vsel %vm1147_vm6, 0.0, %v3456_v63  ;;  %v1148_v34 = vsel %vm1147_vm6, 0.0, %v3455_v2 }
 0x10b   : > { %v3459_v9 = vpop.permute.xlu1 %3458  ;;  %v3464_v5 = vpop.permute.xlu0 %3463 }
 0x10c   : > { %v3466_v16 = vunpack.i.h.bf16 %v3464_v5  ;;  %v3465_v18 = vunpack.i.l.bf16 %v3464_v5  ;;  %v3461_v35 = vunpack.i.h.bf16 %v3459_v9  ;;  %v3460_v25 = vunpack.i.l.bf16 %v3459_v9 }
 0x10e   : > { %v1181_v26 = vsel %vm1180_vm7, %v1148_v34, %v3465_v18  ;;  %v1182_v31 = vsel %vm1180_vm7, %v1149_v22, %v3466_v16  ;;  %v1150_v8 = vsel %vm1147_vm6, %v4346_v44, %v3460_v25  ;;  %v1151_v23 = vsel %vm1147_vm6, %v4349_v45, %v3461_v35 }
 0x10f   : > { %v3469_v46 = vpop.permute.xlu1 %3468  ;;  %v3474_v43 = vpop.permute.xlu0 %3473  ;;  %v1213_v53 = vpack.c.bf16 %v1182_v31, %v1181_v26 }
 0x110   : > { %v3471_v39 = vunpack.i.h.bf16 %v3469_v46  ;;  %v3470_v11 = vunpack.i.l.bf16 %v3469_v46  ;;  %v3476_v60 = vunpack.i.h.bf16 %v3474_v43  ;;  %v3475_v47 = vunpack.i.l.bf16 %v3474_v43 }
 0x111   : > { %3165 = vmatprep.mubr.msk.bf16.mxu0 %vm1256_vm8, %v1213_v53 }
 0x112   : > { %v1183_v57 = vsel %vm1180_vm7, %v1150_v8, %v3470_v11  ;;  %v1184_v48 = vsel %vm1180_vm7, %v1151_v23, %v3471_v39  ;;  %v1153_v54 = vsel %vm1147_vm6, %v4372_v15, %v3476_v60  ;;  %v1152_v44 = vsel %vm1147_vm6, %v4369_v19, %v3475_v47 }
 0x113   : > { %v1214_v1 = vpack.c.bf16 %v1184_v48, %v1183_v57  ;;  %v3479_v12 = vpop.permute.xlu1 %3478  ;;  %v3484_v62 = vpop.permute.xlu0 %3483 }
 0x114   : > { %v3486_v50 = vunpack.i.h.bf16 %v3484_v62  ;;  %v3485_v51 = vunpack.i.l.bf16 %v3484_v62  ;;  %v3481_v45 = vunpack.i.h.bf16 %v3479_v12  ;;  %v3480_v28 = vunpack.i.l.bf16 %v3479_v12 }
 0x115   : > { %3166 = vmatmul.mubr.msk.bf16.vlgmr.msra.gmra.mrb[0].mxu0 %vm1256_vm8, %v1214_v1 }
 0x116   : > { %v1185_v33 = vsel %vm1180_vm7, %v1152_v44, %v3485_v51  ;;  %v1186_v61 = vsel %vm1180_vm7, %v1153_v54, %v3486_v50  ;;  %v1155_v5 = vsel %vm1147_vm6, %v4380_v24, %v3481_v45  ;;  %v1154_v15 = vsel %vm1147_vm6, %v4377_v20, %v3480_v28 }
 0x117   : > { %v1215_v55 = vpack.c.bf16 %v1186_v61, %v1185_v33  ;;  %v3489_v56 = vpop.permute.xlu1 %3488  ;;  %v3494_v63 = vpop.permute.xlu0 %3493 }
 0x118   : > { %v3491_v2 = vunpack.i.h.bf16 %v3489_v56  ;;  %v3490_v9 = vunpack.i.l.bf16 %v3489_v56  ;;  %v3496_v18 = vunpack.i.h.bf16 %v3494_v63  ;;  %v3495_v22 = vunpack.i.l.bf16 %v3494_v63 }
 0x119   : > { %3169 = vmatprep.mubr.msk.bf16.mxu0 %vm1256_vm8, %v1215_v55 }
 0x11a   : > { %v1187_v19 = vsel %vm1180_vm7, %v1154_v15, %v3490_v9  ;;  %v1188_v16 = vsel %vm1180_vm7, %v1155_v5, %v3491_v2  ;;  %v1157_v24 = vsel %vm1147_vm6, %v4400_v49, %v3496_v18  ;;  %v1156_v20 = vsel %vm1147_vm6, %v4397_v13, %v3495_v22 }
 0x11b   : > { %v1216_v34 = vpack.c.bf16 %v1188_v16, %v1187_v19 }
 0x11c   : > { %v3499_v35 = vpop.permute.xlu1 %3498  ;;  %v3504_v25 = vpop.permute.xlu0 %3503 }
 0x11d   : > { %v3506_v26 = vunpack.i.h.bf16 %v3504_v25  ;;  %v3505_v31 = vunpack.i.l.bf16 %v3504_v25  ;;  %3170 = vmatmul.mubr.msk.bf16.gmra.mrb[4].mxu0 %vm1256_vm8, %v1216_v34  ;;  %v3501_v46 = vunpack.i.h.bf16 %v3499_v35  ;;  %v3500_v43 = vunpack.i.l.bf16 %v3499_v35 }
 0x11f   : > { %v1189_v53 = vsel %vm1180_vm7, %v1156_v20, %v3505_v31  ;;  %v1190_v39 = vsel %vm1180_vm7, %v1157_v24, %v3506_v26  ;;  %v1159_v57 = vsel %vm1147_vm6, %v4410_v7, %v3501_v46  ;;  %v1158_v49 = vsel %vm1147_vm6, %v4407_v17, %v3500_v43 }
 0x120   : > { %v1217_v11 = vpack.c.bf16 %v1190_v39, %v1189_v53  ;;  %v3509_v8 = vpop.permute.xlu1 %3508  ;;  %v3514_v23 = vpop.permute.xlu0 %3513 }
 0x121   : > { %v3511_v60 = vunpack.i.h.bf16 %v3509_v8  ;;  %v3510_v47 = vunpack.i.l.bf16 %v3509_v8  ;;  %v3516_v48 = vunpack.i.h.bf16 %v3514_v23  ;;  %v3515_v1 = vunpack.i.l.bf16 %v3514_v23 }
 0x122   : > { %3173 = vmatprep.mubr.msk.bf16.mxu0 %vm1256_vm8, %v1217_v11 }
 0x123   : > { %v1191_v13 = vsel %vm1180_vm7, %v1158_v49, %v3510_v47  ;;  %v1192_v12 = vsel %vm1180_vm7, %v1159_v57, %v3511_v60  ;;  %v1161_v45 = vsel %vm1147_vm6, %v4428_v30, %v3516_v48  ;;  %v1160_v7 = vsel %vm1147_vm6, %v4425_v29, %v3515_v1 }
 0x124   : > { %v1218_v62 = vpack.c.bf16 %v1192_v12, %v1191_v13  ;;  %v3519_v50 = vpop.permute.xlu1 %3518  ;;  %v3524_v51 = vpop.permute.xlu0 %3523 }
 0x125   : > { %v3526_v54 = vunpack.i.h.bf16 %v3524_v51  ;;  %v3525_v44 = vunpack.i.l.bf16 %v3524_v51  ;;  %v3521_v17 = vunpack.i.h.bf16 %v3519_v50  ;;  %v3520_v28 = vunpack.i.l.bf16 %v3519_v50 }
 0x126   : > { %3174 = vmatmul.mubr.msk.bf16.gmra.mrb[8].mxu0 %vm1256_vm8, %v1218_v62 }
 0x127   : > { %v1193_v33 = vsel %vm1180_vm7, %v1160_v7, %v3525_v44  ;;  %v1194_v61 = vsel %vm1180_vm7, %v1161_v45, %v3526_v54  ;;  %v1163_v5 = vsel %vm1147_vm6, %v4436_v52, %v3521_v17  ;;  %v1162_v30 = vsel %vm1147_vm6, %v4433_v32, %v3520_v28 }
 0x128   : > { %v1219_v55 = vpack.c.bf16 %v1194_v61, %v1193_v33  ;;  %v3529_v56 = vpop.permute.xlu1 %3528  ;;  %v3534_v63 = vpop.permute.xlu0 %3533 }
 0x129   : > { %v3531_v2 = vunpack.i.h.bf16 %v3529_v56  ;;  %v3530_v9 = vunpack.i.l.bf16 %v3529_v56  ;;  %v3536_v19 = vunpack.i.h.bf16 %v3534_v63  ;;  %v3535_v16 = vunpack.i.l.bf16 %v3534_v63 }
 0x12a   : > { %3177 = vmatprep.mubr.msk.bf16.mxu0 %vm1256_vm8, %v1219_v55 }
 0x12b   : > { %v1195_v29 = vsel %vm1180_vm7, %v1162_v30, %v3530_v9  ;;  %v1196_v15 = vsel %vm1180_vm7, %v1163_v5, %v3531_v2  ;;  %v1164_v32 = vsel %vm1147_vm6, %v4453_v27, %v3535_v16  ;;  %v1165_v31 = vsel %vm1147_vm6, %v4456_v58, %v3536_v19 }
 0x12c   : > { %v1220_v18 = vpack.c.bf16 %v1196_v15, %v1195_v29 }
 0x12d   : > { %v3539_v22 = vpop.permute.xlu1 %3538  ;;  %v3544_v34 = vpop.permute.xlu0 %3543 }
 0x12e   : > { %v3546_v35 = vunpack.i.h.bf16 %v3544_v34  ;;  %v3545_v25 = vunpack.i.l.bf16 %v3544_v34  ;;  %3178 = vmatmul.mubr.msk.bf16.gmra.mrb[12].mxu0 %vm1256_vm8, %v1220_v18  ;;  %v3541_v26 = vunpack.i.h.bf16 %v3539_v22  ;;  %v3540_v52 = vunpack.i.l.bf16 %v3539_v22 }
 0x130   : > { %v1197_v24 = vsel %vm1180_vm7, %v1164_v32, %v3545_v25  ;;  %v1198_v20 = vsel %vm1180_vm7, %v1165_v31, %v3546_v35  ;;  %v1167_v8 = vsel %vm1147_vm6, %v4464_v36, %v3541_v26  ;;  %v1166_v23 = vsel %vm1147_vm6, %v4461_v59, %v3540_v52 }
 0x131   : > { %v3549_v46 = vpop.permute.xlu1 %3548  ;;  %v3554_v43 = vpop.permute.xlu0 %3553  ;;  %v1221_v53 = vpack.c.bf16 %v1198_v20, %v1197_v24 }
 0x132   : > { %v3551_v39 = vunpack.i.h.bf16 %v3549_v46  ;;  %v3550_v11 = vunpack.i.l.bf16 %v3549_v46  ;;  %v3556_v60 = vunpack.i.h.bf16 %v3554_v43  ;;  %v3555_v27 = vunpack.i.l.bf16 %v3554_v43 }
 0x133   : > { %3181 = vmatprep.mubr.msk.bf16.mxu1 %vm1256_vm8, %v1221_v53 }
 0x134   : > { %v1199_v58 = vsel %vm1180_vm7, %v1166_v23, %v3550_v11  ;;  %v1200_v47 = vsel %vm1180_vm7, %v1167_v8, %v3551_v39  ;;  %v1169_v12 = vsel %vm1147_vm6, %v4484_v38, %v3556_v60  ;;  %v1168_v36 = vsel %vm1147_vm6, %v4481_v37, %v3555_v27 }
 0x135   : > { %v1222_v57 = vpack.c.bf16 %v1200_v47, %v1199_v58  ;;  %v3559_v49 = vpop.permute.xlu1 %3558  ;;  %v3564_v48 = vpop.permute.xlu0 %3563 }
 0x136   : > { %v3566_v1 = vunpack.i.h.bf16 %v3564_v48  ;;  %v3565_v13 = vunpack.i.l.bf16 %v3564_v48  ;;  %v3561_v59 = vunpack.i.h.bf16 %v3559_v49  ;;  %v3560_v62 = vunpack.i.l.bf16 %v3559_v49 }
 0x137   : > { %3182 = vmatmul.mubr.msk.bf16.vlgmr.msra.gmra.mrb[0].mxu1 %vm1256_vm8, %v1222_v57 }
 0x138   : > { %v1201_v50 = vsel %vm1180_vm7, %v1168_v36, %v3565_v13  ;;  %v1202_v51 = vsel %vm1180_vm7, %v1169_v12, %v3566_v1  ;;  %v1171_v28 = vsel %vm1147_vm6, %v4492_v21, %v3561_v59  ;;  %v1170_v38 = vsel %vm1147_vm6, %v4489_v40, %v3560_v62 }
 0x139   : > { %v1223_v54 = vpack.c.bf16 %v1202_v51, %v1201_v50  ;;  %v3569_v44 = vpop.permute.xlu1 %3568  ;;  %v3574_v45 = vpop.permute.xlu0 %3573 }
 0x13a   : > { %v3571_v7 = vunpack.i.h.bf16 %v3569_v44  ;;  %v3570_v17 = vunpack.i.l.bf16 %v3569_v44  ;;  %v3576_v61 = vunpack.i.h.bf16 %v3574_v45  ;;  %v3575_v55 = vunpack.i.l.bf16 %v3574_v45 }
 0x13b   : > { %3185 = vmatprep.mubr.msk.bf16.mxu1 %vm1256_vm8, %v1223_v54 }
 0x13c   : > { %v1203_v37 = vsel %vm1180_vm7, %v1170_v38, %v3570_v17  ;;  %v1204_v33 = vsel %vm1180_vm7, %v1171_v28, %v3571_v7  ;;  %v1173_v21 = vsel %vm1147_vm6, %v4512_v3, %v3576_v61  ;;  %v1172_v40 = vsel %vm1147_vm6, %v4509_v0, %v3575_v55 }
 0x13d   : > { %v1224_v56 = vpack.c.bf16 %v1204_v33, %v1203_v37 }
 0x13e   : > { %v3579_v63 = vpop.permute.xlu1 %3578  ;;  %v3584_v2 = vpop.permute.xlu0 %3583 }
 0x13f   : > { %v3586_v9 = vunpack.i.h.bf16 %v3584_v2  ;;  %v3585_v5 = vunpack.i.l.bf16 %v3584_v2  ;;  %3186 = vmatmul.mubr.msk.bf16.gmra.mrb[4].mxu1 %vm1256_vm8, %v1224_v56  ;;  %v3581_v30 = vunpack.i.h.bf16 %v3579_v63  ;;  %v3580_v29 = vunpack.i.l.bf16 %v3579_v63 }
 0x141   : > { %v1205_v15 = vsel %vm1180_vm7, %v1172_v40, %v3585_v5  ;;  %v1206_v19 = vsel %vm1180_vm7, %v1173_v21, %v3586_v9  ;;  %v1175_v25 = vsel %vm1147_vm6, %v4520_v10, %v3581_v30  ;;  %v1174_v3 = vsel %vm1147_vm6, %v4517_v4, %v3580_v29 }
 0x142   : > { %v1225_v16 = vpack.c.bf16 %v1206_v19, %v1205_v15  ;;  %v3589_v18 = vpop.permute.xlu1 %3588  ;;  %v3594_v22 = vpop.permute.xlu0 %3593 }
 0x143   : > { %v3591_v34 = vunpack.i.h.bf16 %v3589_v18  ;;  %v3590_v35 = vunpack.i.l.bf16 %v3589_v18  ;;  %v3596_v26 = vunpack.i.h.bf16 %v3594_v22  ;;  %v3595_v52 = vunpack.i.l.bf16 %v3594_v22 }
 0x144   : > { %3189 = vmatprep.mubr.msk.bf16.mxu1 %vm1256_vm8, %v1225_v16 }
 0x145   : > { %v1207_v0 = vsel %vm1180_vm7, %v1174_v3, %v3590_v35  ;;  %v1208_v32 = vsel %vm1180_vm7, %v1175_v25, %v3591_v34  ;;  %v1177_v10 = vsel %vm1147_vm6, %v4540_v42, %v3596_v26  ;;  %v1176_v4 = vsel %vm1147_vm6, %v4537_v41, %v3595_v52 }
 0x146   : > { %v1226_v31 = vpack.c.bf16 %v1208_v32, %v1207_v0  ;;  %v3599_v24 = vpop.permute.xlu1 %3598  ;;  %v3604_v20 = vpop.permute.xlu0 %3603 }
 0x147   : > { %v3601_v46 = vunpack.i.h.bf16 %v3599_v24  ;;  %v3600_v43 = vunpack.i.l.bf16 %v3599_v24  ;;  %v3606_v53 = vunpack.i.h.bf16 %v3604_v20  ;;  %v3605_v39 = vunpack.i.l.bf16 %v3604_v20 }
 0x148   : > { %3190 = vmatmul.mubr.msk.bf16.gmra.mrb[8].mxu1 %vm1256_vm8, %v1226_v31 }
 0x149   : > { %v1179_v11 = vsel %vm1147_vm6, %v4548_v14, %v3601_v46  ;;  %v1178_v8 = vsel %vm1147_vm6, %v4545_v6, %v3600_v43  ;;  %v1209_v23 = vsel %vm1180_vm7, %v1176_v4, %v3605_v39  ;;  %v1210_v60 = vsel %vm1180_vm7, %v1177_v10, %v3606_v53  ;;  %v4682_v6 = vld [vmem:[%s5581_s2] ss:$0 sm:$0xff] }
 0x14a   : > { %v1227_v27 = vpack.c.bf16 %v1210_v60, %v1209_v23  ;;  %v4671_v58 = vpop.permute.xlu1 %1114 }
 0x14b   : > { %v1211_v42 = vsel %vm1180_vm7, %v1178_v8, %v4671_v58  ;;  %v1212_v41 = vsel %vm1180_vm7, %v1179_v11, %v4671_v58 }
 0x14c   : > { %3193 = vmatprep.mubr.msk.bf16.mxu1 %vm1256_vm8, %v1227_v27  ;;  %v1228_v47 = vpack.c.bf16 %v1212_v41, %v1211_v42 }
 0x150   : > { %3194 = vmatmul.mubr.msk.bf16.gmra.mrb[12].mxu1 %vm1256_vm8, %v1228_v47 }
 0x1e8   : > { %v3167_v14 = vpop.f32.mrb[0].mxu0 }
 0x1e9   : > { %v1352_v57 = vadd.f32 %v3167_v14, %v4682_v6  ;;  %v1343_v49 = vpop.f32.mrb[1].mxu0 }
 0x1ea   : > { %v1344_v48 = vadd.f32 %v4682_v6, %v1343_v49  ;;  %v3168_v1 = vpop.f32.mrb[2].mxu0 }
 0x1eb   : > { %v1472_v13 = vmax.f32 %v1352_v57, 0.0  ;;  %v1355_v12 = vadd.f32 %v3168_v1, %v4682_v6  ;;  %v1346_v36 = vpop.f32.mrb[3].mxu0 }
 0x1ec   : > { %v1470_v59 = vmax.f32 %v1344_v48, 0.0  ;;  %v1347_v62 = vadd.f32 %v4682_v6, %v1346_v36 }
 0x1ed   : > { %v1537_v50 = vrot.slane %v1472_v13, 7  ;;  %v1473_v51 = vmax.f32 %v1355_v12, 0.0 }
 0x1ee   : > { %v1471_v54 = vmax.f32 %v1347_v62, 0.0  ;;  %v1534_v45 = vrot.slane %v1470_v59, 7 }
 0x1ef   : > { %v1538_v44 = vrot.slane %v1473_v51, 7  ;;  %v4689_v28 = vsel %vm344_vm0, 0.0, %v1537_v50 }
 0x1f0   : > { %v1535_v7 = vrot.slane %v1471_v54, 7  ;;  %v3171_v17 = vpop.f32.mrb[4].mxu0  ;;  %v1699_v30 = vrot.slane %v4689_v28, 1  ;;  %v1875_v29 = vrot.slane %v4689_v28, 2  ;;  %v4705_v15 = vsel %vm344_vm0, 0.0, %v1534_v45 }
 0x1f1   : > { %v4692_v38 = vsel %vm344_vm0, %v1537_v50, %v1538_v44  ;;  %v1647_v37 = vsel %vm344_vm0, %v1538_v44, 0.0  ;;  %v1359_v33 = vpop.f32.mrb[5].mxu0  ;;  %v1368_v5 = vadd.f32 %v3171_v17, %v4682_v6  ;;  %v1694_v8 = vrot.slane %v4705_v15, 1 }
 0x1f2   : > { %v1700_v61 = vrot.slane %v4692_v38, 1  ;;  %v1702_v55 = vrot.slane %v1647_v37, 1  ;;  %v1876_v56 = vrot.slane %v4692_v38, 2  ;;  %v1878_v63 = vrot.slane %v1647_v37, 2  ;;  %v3172_v2 = vpop.f32.mrb[6].mxu0 }
 0x1f3   : > { %v4698_v9 = vsel %vm344_vm0, %v1534_v45, %v1535_v7  ;;  %v1360_v21 = vadd.f32 %v4682_v6, %v1359_v33  ;;  %v1362_v40 = vpop.f32.mrb[7].mxu0  ;;  %v1646_v19 = vsel %vm344_vm0, %v1535_v7, 0.0  ;;  %v1476_v16 = vmax.f32 %v1368_v5, 0.0 }
 0x1f4   : > { %v1371_v22 = vadd.f32 %v3172_v2, %v4682_v6  ;;  %v1363_v34 = vadd.f32 %v4682_v6, %v1362_v40  ;;  %v1877_v35 = vsel %vm682_vm2, %v1875_v29, %v1876_v56  ;;  %v1879_v25 = vsel %vm682_vm2, %v1876_v56, %v1878_v63 }
 0x1f5   : > { %v1474_v18 = vmax.f32 %v1360_v21, 0.0  ;;  %v1701_v3 = vsel %vm505_vm1, %v1699_v30, %v1700_v61  ;;  %v1703_v26 = vsel %vm505_vm1, %v1700_v61, %v1702_v55  ;;  %v1543_v52 = vrot.slane %v1476_v16, 7 }
 0x1f6   : > { %v1477_v32 = vmax.f32 %v1371_v22, 0.0  ;;  %v1475_v31 = vmax.f32 %v1363_v34, 0.0  ;;  %v1695_v24 = vrot.slane %v4698_v9, 1  ;;  %v1697_v20 = vrot.slane %v1646_v19, 1 }
 0x1f7   : > { %v1540_v0 = vrot.slane %v1474_v18, 7  ;;  %v3612_v46 = vpack.i.bf16 %v1879_v25, %v1877_v35  ;;  %v3607_v43 = vpack.i.bf16 %v1703_v26, %v1701_v3  ;;  %v4716_v53 = vsel %vm344_vm0, 0.0, %v1543_v52 }
 0x1f8   : > { %v1544_v10 = vrot.slane %v1477_v32, 7  ;;  %v1541_v4 = vrot.slane %v1475_v31, 7  ;;  %v1870_v23 = vrot.slane %v4705_v15, 2  ;;  %v1871_v60 = vrot.slane %v4698_v9, 2 }
 0x1f9   : > { %v4719_v39 = vsel %vm344_vm0, 0.0, %v1540_v0  ;;  %v3175_v11 = vpop.f32.mrb[8].mxu0  ;;  %v1873_v27 = vrot.slane %v1646_v19, 2  ;;  %3613 = vrot.lane.b32.xlu0 %v3612_v46, %s3969_s8  ;;  %3608 = vrot.lane.b32.xlu1 %v3607_v43, %s3968_s30  ;;  %v1709_v48 = vrot.slane %v4716_v53, 1  ;;  %v1696_v12 = vsel %vm505_vm1, %v1694_v8, %v1695_v24 }
 0x1fa   : > { %v1375_v42 = vpop.f32.mrb[9].mxu0  ;;  %v4727_v41 = vsel %vm344_vm0, %v1543_v52, %v1544_v10  ;;  %v4730_v47 = vsel %vm344_vm0, %v1544_v10, 0.0  ;;  %v4733_v14 = vsel %vm344_vm0, %v1540_v0, %v1541_v4  ;;  %v4736_v57 = vsel %vm344_vm0, %v1541_v4, 0.0 }
 0x1fb   : > { %v3176_v49 = vpop.f32.mrb[10].mxu0  ;;  %v1704_v1 = vrot.slane %v4719_v39, 1  ;;  %v1698_v36 = vsel %vm505_vm1, %v1695_v24, %v1697_v20  ;;  %v1710_v59 = vrot.slane %v4727_v41, 1  ;;  %v1712_v62 = vrot.slane %v4730_v47, 1 }
 0x1fc   : > { %v1378_v13 = vpop.f32.mrb[11].mxu0  ;;  %v1705_v50 = vrot.slane %v4733_v14, 1  ;;  %v1707_v51 = vrot.slane %v4736_v57, 1  ;;  %v1384_v54 = vadd.f32 %v3175_v11, %v4682_v6  ;;  %v1376_v44 = vadd.f32 %v4682_v6, %v1375_v42 }
 0x1fd   : > { %v1387_v45 = vadd.f32 %v3176_v49, %v4682_v6  ;;  %v1379_v7 = vadd.f32 %v4682_v6, %v1378_v13  ;;  %v3617_v17 = vpack.i.bf16 %v1698_v36, %v1696_v12  ;;  %v1872_v37 = vsel %vm682_vm2, %v1870_v23, %v1871_v60 }
 0x1fe   : > { %v1874_v33 = vsel %vm682_vm2, %v1871_v60, %v1873_v27  ;;  %v1706_v61 = vsel %vm505_vm1, %v1704_v1, %v1705_v50  ;;  %v1480_v55 = vmax.f32 %v1384_v54, 0.0  ;;  %v1478_v56 = vmax.f32 %v1376_v44, 0.0 }
 0x1ff   : > { %v1481_v63 = vmax.f32 %v1387_v45, 0.0  ;;  %v1479_v2 = vmax.f32 %v1379_v7, 0.0  ;;  %3618 = vrot.lane.b32.xlu0 %v3617_v17, %s3968_s30  ;;  %v3622_v5 = vpack.i.bf16 %v1874_v33, %v1872_v37  ;;  %v1708_v40 = vsel %vm505_vm1, %v1705_v50, %v1707_v51 }
 0x200   : > { %v1711_v30 = vsel %vm505_vm1, %v1709_v48, %v1710_v59  ;;  %v1549_v29 = vrot.slane %v1480_v55, 7  ;;  %v1546_v19 = vrot.slane %v1478_v56, 7  ;;  %v1713_v22 = vsel %vm505_vm1, %v1710_v59, %v1712_v62 }
 0x201   : > { %v3179_v21 = vpop.f32.mrb[12].mxu0  ;;  %v1550_v16 = vrot.slane %v1481_v63, 7  ;;  %v1547_v34 = vrot.slane %v1479_v2, 7  ;;  %v3637_v25 = vpack.i.bf16 %v1708_v40, %v1706_v61  ;;  %v1885_v52 = vrot.slane %v4716_v53, 2 }
 0x202   : > { %v1391_v18 = vpop.f32.mrb[13].mxu0  ;;  %v1400_v35 = vadd.f32 %v3179_v21, %v4682_v6  ;;  %v1880_v31 = vrot.slane %v4719_v39, 2  ;;  %v1886_v24 = vrot.slane %v4727_v41, 2  ;;  %v1888_v20 = vrot.slane %v4730_v47, 2 }
 0x203   : > { %v1392_v3 = vadd.f32 %v4682_v6, %v1391_v18  ;;  %v3180_v26 = vpop.f32.mrb[14].mxu0  ;;  %v4761_v0 = vsel %vm344_vm0, %v1549_v29, %v1550_v16  ;;  %v4767_v46 = vsel %vm344_vm0, 0.0, %v1549_v29  ;;  %3623 = vrot.lane.b32.xlu0 %v3622_v5, %s3969_s8  ;;  %3638 = vrot.lane.b32.xlu1 %v3637_v25, %s3968_s30  ;;  %v1881_v43 = vrot.slane %v4733_v14, 2 }
 0x204   : > { %v1394_v32 = vpop.f32.mrb[15].mxu0  ;;  %v1883_v10 = vrot.slane %v4736_v57, 2  ;;  %v4774_v4 = vsel %vm344_vm0, 0.0, %v1546_v19  ;;  %v3627_v11 = vpack.i.bf16 %v1713_v22, %v1711_v30  ;;  %v4777_v8 = vsel %vm344_vm0, %v1550_v16, 0.0 }
 0x205   : > { %v4780_v23 = vsel %vm344_vm0, %v1546_v19, %v1547_v34  ;;  %v1484_v60 = vmax.f32 %v1400_v35, 0.0  ;;  %v1482_v27 = vmax.f32 %v1392_v3, 0.0  ;;  %v1719_v42 = vrot.slane %v4767_v46, 1 }
 0x206   : > { %v1895_v47 = vrot.slane %v4767_v46, 2  ;;  %v4785_v49 = vsel %vm344_vm0, %v1547_v34, 0.0  ;;  %v1715_v57 = vrot.slane %v4780_v23, 1  ;;  %v1403_v13 = vadd.f32 %v3180_v26, %v4682_v6 }
 0x207   : > { %v1555_v48 = vrot.slane %v1484_v60, 7  ;;  %v1552_v1 = vrot.slane %v1482_v27, 7  ;;  %v1395_v12 = vadd.f32 %v4682_v6, %v1394_v32  ;;  %3628 = vrot.lane.b32.xlu0 %v3627_v11, %s3968_s30  ;;  %v1882_v36 = vsel %vm682_vm2, %v1880_v31, %v1881_v43 }
 0x208   : > { %v1884_v59 = vsel %vm682_vm2, %v1881_v43, %v1883_v10  ;;  %v1887_v62 = vsel %vm682_vm2, %v1885_v52, %v1886_v24  ;;  %v1889_v50 = vsel %vm682_vm2, %v1886_v24, %v1888_v20  ;;  %v1714_v54 = vrot.slane %v4774_v4, 1 }
 0x209   : > { %v1717_v44 = vrot.slane %v4785_v49, 1  ;;  %v1485_v45 = vmax.f32 %v1403_v13, 0.0  ;;  %v1483_v7 = vmax.f32 %v1395_v12, 0.0  ;;  %v1890_v37 = vrot.slane %v4774_v4, 2 }
 0x20a   : > { %v3183_v51 = vpop.f32.mrb[0].mxu1  ;;  %v1720_v33 = vrot.slane %v4761_v0, 1  ;;  %v1722_v61 = vrot.slane %v4777_v8, 1  ;;  %v4801_v55 = vsel %vm344_vm0, 0.0, %v1555_v48  ;;  %v3642_v5 = vpack.i.bf16 %v1884_v59, %v1882_v36 }
 0x20b   : > { %v1407_v17 = vpop.f32.mrb[1].mxu1  ;;  %v1556_v63 = vrot.slane %v1485_v45, 7  ;;  %v1553_v2 = vrot.slane %v1483_v7, 7  ;;  %v3632_v21 = vpack.i.bf16 %v1889_v50, %v1887_v62  ;;  %v4804_v30 = vsel %vm344_vm0, 0.0, %v1552_v1 }
 0x20c   : > { %v3184_v56 = vpop.f32.mrb[2].mxu1  ;;  %v1416_v29 = vadd.f32 %v3183_v51, %v4682_v6  ;;  %v1716_v19 = vsel %vm505_vm1, %v1714_v54, %v1715_v57  ;;  %v1408_v16 = vadd.f32 %v4682_v6, %v1407_v17  ;;  %v1891_v18 = vrot.slane %v4780_v23, 2  ;;  %3643 = vrot.lane.b32.xlu1 %v3642_v5, %s3969_s8 }
 0x20d   : > { %v1410_v40 = vpop.f32.mrb[3].mxu1  ;;  %v4811_v22 = vsel %vm344_vm0, %v1555_v48, %v1556_v63  ;;  %v4814_v34 = vsel %vm344_vm0, %v1552_v1, %v1553_v2  ;;  %3633 = vrot.lane.b32.xlu0 %v3632_v21, %s3969_s8  ;;  %v1718_v35 = vsel %vm505_vm1, %v1715_v57, %v1717_v44  ;;  %v1896_v25 = vrot.slane %v4761_v0, 2 }
 0x20e   : > { %v1898_v3 = vrot.slane %v4777_v8, 2  ;;  %v1893_v26 = vrot.slane %v4785_v49, 2  ;;  %v1729_v52 = vrot.slane %v4801_v55, 1  ;;  %v1905_v32 = vrot.slane %v4801_v55, 2 }
 0x20f   : > { %v1724_v31 = vrot.slane %v4804_v30, 1  ;;  %v4826_v24 = vsel %vm344_vm0, %v1556_v63, 0.0  ;;  %v4829_v20 = vsel %vm344_vm0, %v1553_v2, 0.0  ;;  %v1488_v43 = vmax.f32 %v1416_v29, 0.0 }
 0x210   : > { %v3657_v10 = vpack.i.bf16 %v1718_v35, %v1716_v19  ;;  %v1486_v11 = vmax.f32 %v1408_v16, 0.0  ;;  %v1419_v60 = vadd.f32 %v3184_v56, %v4682_v6  ;;  %v1411_v27 = vadd.f32 %v4682_v6, %v1410_v40 }
 0x211   : > { %v1721_v49 = vsel %vm505_vm1, %v1719_v42, %v1720_v33  ;;  %v1723_v57 = vsel %vm505_vm1, %v1720_v33, %v1722_v61  ;;  %v1892_v48 = vsel %vm682_vm2, %v1890_v37, %v1891_v18  ;;  %v1561_v13 = vrot.slane %v1488_v43, 7 }
 0x212   : > { %v3187_v8 = vpop.f32.mrb[4].mxu1  ;;  %3658 = vrot.lane.b32.xlu1 %v3657_v10, %s3968_s30  ;;  %v1558_v12 = vrot.slane %v1486_v11, 7  ;;  %v1489_v36 = vmax.f32 %v1419_v60, 0.0  ;;  %v3647_v59 = vpack.i.bf16 %v1723_v57, %v1721_v49  ;;  %v1487_v50 = vmax.f32 %v1411_v27, 0.0 }
 0x213   : > { %v1423_v1 = vpop.f32.mrb[5].mxu1  ;;  %v1894_v51 = vsel %vm682_vm2, %v1891_v18, %v1893_v26  ;;  %v1897_v54 = vsel %vm682_vm2, %v1895_v47, %v1896_v25  ;;  %v1899_v42 = vsel %vm682_vm2, %v1896_v25, %v1898_v3  ;;  %v1900_v45 = vrot.slane %v4804_v30, 2 }
 0x214   : > { %v3188_v62 = vpop.f32.mrb[6].mxu1  ;;  %v1725_v7 = vrot.slane %v4814_v34, 1  ;;  %v1562_v17 = vrot.slane %v1489_v36, 7  ;;  %3648 = vrot.lane.b32.xlu0 %v3647_v59, %s3968_s30  ;;  %v3662_v37 = vpack.i.bf16 %v1894_v51, %v1892_v48  ;;  %v1730_v33 = vrot.slane %v4811_v22, 1 }
 0x215   : > { %v1426_v44 = vpop.f32.mrb[7].mxu1  ;;  %v1732_v61 = vrot.slane %v4826_v24, 1  ;;  %v1727_v56 = vrot.slane %v4829_v20, 1  ;;  %v4849_v63 = vsel %vm344_vm0, 0.0, %v1561_v13  ;;  %v4852_v47 = vsel %vm344_vm0, 0.0, %v1558_v12 }
 0x216   : > { %v4855_v2 = vsel %vm344_vm0, %v1561_v13, %v1562_v17  ;;  %v1559_v5 = vrot.slane %v1487_v50, 7  ;;  %3663 = vrot.lane.b32.xlu1 %v3662_v37, %s3969_s8  ;;  %v3652_v21 = vpack.i.bf16 %v1899_v42, %v1897_v54  ;;  %v1906_v40 = vrot.slane %v4811_v22, 2 }
 0x217   : > { %v1908_v29 = vrot.slane %v4826_v24, 2  ;;  %v1901_v19 = vrot.slane %v4814_v34, 2  ;;  %v1903_v16 = vrot.slane %v4829_v20, 2  ;;  %v1739_v18 = vrot.slane %v4849_v63, 1 }
 0x218   : > { %v4864_v35 = vsel %vm344_vm0, %v1558_v12, %v1559_v5  ;;  %3653 = vrot.lane.b32.xlu0 %v3652_v21, %s3969_s8  ;;  %v1432_v25 = vadd.f32 %v3187_v8, %v4682_v6  ;;  %v1726_v3 = vsel %vm505_vm1, %v1724_v31, %v1725_v7  ;;  %v1915_v26 = vrot.slane %v4849_v63, 2 }
 0x219   : > { %v1734_v43 = vrot.slane %v4852_v47, 1  ;;  %v1910_v24 = vrot.slane %v4852_v47, 2  ;;  %v4873_v10 = vsel %vm344_vm0, %v1559_v5, 0.0  ;;  %v1728_v60 = vsel %vm505_vm1, %v1725_v7, %v1727_v56 }
 0x21a   : > { %v1492_v11 = vmax.f32 %v1432_v25, 0.0  ;;  %v1424_v27 = vadd.f32 %v4682_v6, %v1423_v1  ;;  %v1435_v49 = vadd.f32 %v3188_v62, %v4682_v6  ;;  %v3672_v57 = vpack.i.bf16 %v1728_v60, %v1726_v3 }
 0x21b   : > { %v3191_v20 = vpop.f32.mrb[8].mxu1  ;;  %v1427_v31 = vadd.f32 %v4682_v6, %v1426_v44  ;;  %v1731_v48 = vsel %vm505_vm1, %v1729_v52, %v1730_v33  ;;  %v1733_v13 = vsel %vm505_vm1, %v1730_v33, %v1732_v61  ;;  %v1902_v1 = vsel %vm682_vm2, %v1900_v45, %v1901_v19 }
 0x21c   : > { %v1439_v8 = vpop.f32.mrb[9].mxu1  ;;  %v1567_v36 = vrot.slane %v1492_v11, 7  ;;  %v1490_v59 = vmax.f32 %v1424_v27, 0.0  ;;  %v1493_v50 = vmax.f32 %v1435_v49, 0.0  ;;  %v3667_v51 = vpack.i.bf16 %v1733_v13, %v1731_v48  ;;  %3673 = vrot.lane.b32.xlu1 %v3672_v57, %s3968_s30 }
 0x21d   : > { %v3192_v12 = vpop.f32.mrb[10].mxu1  ;;  %v1491_v42 = vmax.f32 %v1427_v31, 0.0  ;;  %v1904_v62 = vsel %vm682_vm2, %v1901_v19, %v1903_v16  ;;  %v1907_v44 = vsel %vm682_vm2, %v1905_v32, %v1906_v40  ;;  %v1655_v52 = vsel %vm344_vm0, %v1562_v17, 0.0 }
 0x21e   : > { %v1442_v54 = vpop.f32.mrb[11].mxu1  ;;  %v1735_v7 = vrot.slane %v4864_v35, 1  ;;  %v1564_v37 = vrot.slane %v1490_v59, 7  ;;  %v1568_v33 = vrot.slane %v1493_v50, 7  ;;  %3668 = vrot.lane.b32.xlu0 %v3667_v51, %s3968_s30  ;;  %v4891_v61 = vsel %vm344_vm0, 0.0, %v1567_v36 }
 0x21f   : > { %v1565_v56 = vrot.slane %v1491_v42, 7  ;;  %v3677_v5 = vpack.i.bf16 %v1904_v62, %v1902_v1  ;;  %v1909_v45 = vsel %vm682_vm2, %v1906_v40, %v1908_v29  ;;  %v1737_v21 = vrot.slane %v4873_v10, 1 }
 0x220   : > { %v4896_v19 = vsel %vm344_vm0, 0.0, %v1564_v37  ;;  %v4899_v32 = vsel %vm344_vm0, %v1567_v36, %v1568_v33  ;;  %v3687_v17 = vpack.i.bf16 %v1909_v45, %v1907_v44  ;;  %v1740_v16 = vrot.slane %v4855_v2, 1 }
 0x221   : > { %v1742_v25 = vrot.slane %v1655_v52, 1  ;;  %v1916_v3 = vrot.slane %v4855_v2, 2  ;;  %v1918_v11 = vrot.slane %v1655_v52, 2  ;;  %3678 = vrot.lane.b32.xlu1 %v3677_v5, %s3969_s8  ;;  %v1911_v40 = vrot.slane %v4864_v35, 2 }
 0x222   : > { %v1913_v29 = vrot.slane %v4873_v10, 2  ;;  %v1749_v27 = vrot.slane %v4891_v61, 1  ;;  %v4908_v49 = vsel %vm344_vm0, %v1564_v37, %v1565_v56  ;;  %3688 = vrot.lane.b32.xlu0 %v3687_v17, %s3969_s8  ;;  %v1925_v31 = vrot.slane %v4891_v61, 2 }
 0x223   : > { %v3195_v60 = vpop.f32.mrb[12].mxu1  ;;  %v1744_v48 = vrot.slane %v4896_v19, 1  ;;  %v4914_v13 = vsel %vm344_vm0, %v1568_v33, 0.0  ;;  %v4917_v36 = vsel %vm344_vm0, %v1565_v56, 0.0  ;;  %v1448_v10 = vadd.f32 %v3191_v20, %v4682_v6 }
 0x224   : > { %v1455_v57 = vpop.f32.mrb[13].mxu1  ;;  %v1736_v50 = vsel %vm505_vm1, %v1734_v43, %v1735_v7  ;;  %v1738_v51 = vsel %vm505_vm1, %v1735_v7, %v1737_v21  ;;  %v1440_v42 = vadd.f32 %v4682_v6, %v1439_v8  ;;  %v1451_v44 = vadd.f32 %v3192_v12, %v4682_v6 }
 0x225   : > { %v3196_v59 = vpop.f32.mrb[14].mxu1  ;;  %v3682_v62 = vpack.i.bf16 %v1738_v51, %v1736_v50  ;;  %v1443_v52 = vadd.f32 %v4682_v6, %v1442_v54  ;;  %v1741_v37 = vsel %vm505_vm1, %v1739_v18, %v1740_v16  ;;  %v1496_v33 = vmax.f32 %v1448_v10, 0.0 }
 0x226   : > { %v1458_v1 = vpop.f32.mrb[15].mxu1  ;;  %v1494_v56 = vmax.f32 %v1440_v42, 0.0  ;;  %v1743_v20 = vsel %vm505_vm1, %v1740_v16, %v1742_v25  ;;  %v1912_v43 = vsel %vm682_vm2, %v1910_v24, %v1911_v40  ;;  %v1497_v8 = vmax.f32 %v1451_v44, 0.0 }
 0x227   : > { %3683 = vrot.lane.b32.xlu1 %v3682_v62, %s3968_s30  ;;  %v1495_v7 = vmax.f32 %v1443_v52, 0.0  ;;  %v3697_v5 = vpack.i.bf16 %v1743_v20, %v1741_v37  ;;  %v1914_v12 = vsel %vm682_vm2, %v1911_v40, %v1913_v29  ;;  %v1745_v54 = vrot.slane %v4908_v49, 1 }
 0x228   : > { %v1573_v45 = vrot.slane %v1496_v33, 7  ;;  %v1570_v21 = vrot.slane %v1494_v56, 7  ;;  %v1917_v18 = vsel %vm682_vm2, %v1915_v26, %v1916_v3  ;;  %v1574_v17 = vrot.slane %v1497_v8, 7 }
 0x229   : > { %v1571_v16 = vrot.slane %v1495_v7, 7  ;;  %3698 = vrot.lane.b32.xlu0 %v3697_v5, %s3968_s30  ;;  %v3692_v24 = vpack.i.bf16 %v1914_v12, %v1912_v43  ;;  %v1919_v25 = vsel %vm682_vm2, %v1916_v3, %v1918_v11  ;;  %v1920_v10 = vrot.slane %v4896_v19, 2 }
 0x22a   : > { %v1750_v50 = vrot.slane %v4899_v32, 1  ;;  %v1752_v40 = vrot.slane %v4914_v13, 1  ;;  %v4944_v29 = vsel %vm344_vm0, 0.0, %v1573_v45  ;;  %v1747_v51 = vrot.slane %v4917_v36, 1 }
 0x22b   : > { %v4948_v26 = vsel %vm344_vm0, 0.0, %v1570_v21  ;;  %3693 = vrot.lane.b32.xlu1 %v3692_v24, %s3969_s8  ;;  %v3707_v42 = vpack.i.bf16 %v1919_v25, %v1917_v18  ;;  %v1464_v62 = vadd.f32 %v3195_v60, %v4682_v6  ;;  %v1926_v3 = vrot.slane %v4899_v32, 2 }
 0x22c   : > { %v1928_v11 = vrot.slane %v4914_v13, 2  ;;  %v4955_v44 = vsel %vm344_vm0, %v1573_v45, %v1574_v17  ;;  %v4958_v52 = vsel %vm344_vm0, %v1570_v21, %v1571_v16  ;;  %v1921_v37 = vrot.slane %v4908_v49, 2 }
 0x22d   : > { %v1923_v33 = vrot.slane %v4917_v36, 2  ;;  %v1759_v56 = vrot.slane %v4944_v29, 1  ;;  %3708 = vrot.lane.b32.xlu0 %v3707_v42, %s3969_s8  ;;  %v1746_v60 = vsel %vm505_vm1, %v1744_v48, %v1745_v54  ;;  %v1935_v20 = vrot.slane %v4944_v29, 2 }
 0x22e   : > { %v1754_v13 = vrot.slane %v4948_v26, 1  ;;  %v1659_v43 = vsel %vm344_vm0, %v1574_v17, 0.0  ;;  %v1658_v8 = vsel %vm344_vm0, %v1571_v16, 0.0  ;;  %v1500_v7 = vmax.f32 %v1464_v62, 0.0 }
 0x22f   : > { %v1748_v5 = vsel %vm505_vm1, %v1745_v54, %v1747_v51  ;;  %v1456_v12 = vadd.f32 %v4682_v6, %v1455_v57  ;;  %v1467_v36 = vadd.f32 %v3196_v59, %v4682_v6  ;;  %v1459_v21 = vadd.f32 %v4682_v6, %v1458_v1 }
 0x230   : > { %v3702_v45 = vpack.i.bf16 %v1748_v5, %v1746_v60  ;;  %v1751_v48 = vsel %vm505_vm1, %v1749_v27, %v1750_v50  ;;  %v1753_v18 = vsel %vm505_vm1, %v1750_v50, %v1752_v40  ;;  %v1760_v17 = vrot.slane %v4955_v44, 1 }
 0x231   : > { %v1498_v24 = vmax.f32 %v1456_v12, 0.0  ;;  %v1501_v16 = vmax.f32 %v1467_v36, 0.0  ;;  %v3717_v25 = vpack.i.bf16 %v1753_v18, %v1751_v48  ;;  %v1499_v54 = vmax.f32 %v1459_v21, 0.0 }
 0x232   : > { %3703 = vrot.lane.b32.xlu1 %v3702_v45, %s3968_s30  ;;  %v1922_v57 = vsel %vm682_vm2, %v1920_v10, %v1921_v37  ;;  %v1924_v59 = vsel %vm682_vm2, %v1921_v37, %v1923_v33  ;;  %v1927_v6 = vsel %vm682_vm2, %v1925_v31, %v1926_v3  ;;  %v1762_v1 = vrot.slane %v1659_v43, 1 }
 0x233   : > { %v1579_v27 = vrot.slane %v1500_v7, 7  ;;  %v1576_v51 = vrot.slane %v1498_v24, 7  ;;  %v1580_v50 = vrot.slane %v1501_v16, 7  ;;  %3718 = vrot.lane.b32.xlu0 %v3717_v25, %s3968_s30  ;;  %v1755_v40 = vrot.slane %v4958_v52, 1 }
 0x234   : > { %v1577_v42 = vrot.slane %v1499_v54, 7  ;;  %v3712_v62 = vpack.i.bf16 %v1924_v59, %v1922_v57  ;;  %v1929_v60 = vsel %vm682_vm2, %v1926_v3, %v1928_v11  ;;  %v1757_v5 = vrot.slane %v1658_v8, 1 }
 0x235   : > { %v4988_v10 = vsel %vm344_vm0, 0.0, %v1576_v51  ;;  %v4991_v37 = vsel %vm344_vm0, %v1579_v27, %v1580_v50  ;;  %v3727_v31 = vpack.i.bf16 %v1929_v60, %v1927_v6  ;;  %v1930_v33 = vrot.slane %v4948_v26, 2 }
 0x236   : > { %v1936_v7 = vrot.slane %v4955_v44, 2  ;;  %v1938_v12 = vrot.slane %v1659_v43, 2  ;;  %v1931_v36 = vrot.slane %v4958_v52, 2  ;;  %3713 = vrot.lane.b32.xlu1 %v3712_v62, %s3969_s8  ;;  %v1933_v45 = vrot.slane %v1658_v8, 2 }
 0x237   : > { %v1661_v3 = vsel %vm344_vm0, %v1580_v50, 0.0  ;;  %v4999_v11 = vsel %vm344_vm0, %v1576_v51, %v1577_v42  ;;  %v1660_v21 = vsel %vm344_vm0, %v1577_v42, 0.0  ;;  %3728 = vrot.lane.b32.xlu0 %v3727_v31, %s3969_s8  ;;  %v5004_v48 = vsel %vm344_vm0, 0.0, %v1579_v27 }
 0x238   : > { %v1764_v18 = vrot.slane %v4988_v10, 1  ;;  %v1765_v43 = vrot.slane %v4999_v11, 1  ;;  %v1767_v24 = vrot.slane %v1660_v21, 1  ;;  %v1756_v16 = vsel %vm505_vm1, %v1754_v13, %v1755_v40 }
 0x239   : > { %v1758_v8 = vsel %vm505_vm1, %v1755_v40, %v1757_v5  ;;  %v1761_v25 = vsel %vm505_vm1, %v1759_v56, %v1760_v17  ;;  %v1763_v54 = vsel %vm505_vm1, %v1760_v17, %v1762_v1  ;;  %v1770_v57 = vrot.slane %v4991_v37, 1 }
 0x23a   : > { %v1772_v59 = vrot.slane %v1661_v3, 1  ;;  %v3722_v6 = vpack.i.bf16 %v1758_v8, %v1756_v16  ;;  %v3737_v51 = vpack.i.bf16 %v1763_v54, %v1761_v25  ;;  %v1932_v27 = vsel %vm682_vm2, %v1930_v33, %v1931_v36 }
 0x23b   : > { %v1934_v50 = vsel %vm682_vm2, %v1931_v36, %v1933_v45  ;;  %v1937_v42 = vsel %vm682_vm2, %v1935_v20, %v1936_v7  ;;  %v1939_v62 = vsel %vm682_vm2, %v1936_v7, %v1938_v12  ;;  %v1769_v56 = vrot.slane %v5004_v48, 1 }
 0x23c   : > { %3723 = vrot.lane.b32.xlu1 %v3722_v6, %s3968_s30  ;;  %3738 = vrot.lane.b32.xlu0 %v3737_v51, %s3968_s30  ;;  %v1766_v13 = vsel %vm505_vm1, %v1764_v18, %v1765_v43  ;;  %v1768_v17 = vsel %vm505_vm1, %v1765_v43, %v1767_v24  ;;  %v3732_v1 = vpack.i.bf16 %v1934_v50, %v1932_v27  ;;  %v1941_v60 = vrot.slane %v4999_v11, 2  ;;  %v3926_v24 = vld [vmem:[%s5582_s3 + $0x8] sm:$0xff]  }
 0x23d   : > { %v3742_v40 = vpack.i.bf16 %v1939_v62, %v1937_v42  ;;  %v1943_v5 = vrot.slane %v1660_v21, 2  ;;  %v1771_v31 = vsel %vm505_vm1, %v1769_v56, %v1770_v57  ;;  %v1773_v20 = vsel %vm505_vm1, %v1770_v57, %v1772_v59  ;;  %v3925_v21 = vld [vmem:[%s5582_s3] sm:$0xff]   ;;  %v3927_v57 = vld [vmem:[%s5582_s3 + $0x10] ss:$0 sps:$4 sm:$0x33]  }
 0x23e   : > { %v3752_v33 = vpack.i.bf16 %v1768_v17, %v1766_v13  ;;  %v1940_v7 = vrot.slane %v4988_v10, 2  ;;  %v3747_v12 = vpack.i.bf16 %v1773_v20, %v1771_v31  ;;  %v1946_v36 = vrot.slane %v4991_v37, 2  ;;  %3197 = vmatprep.subr.bf16.mxu1 %v3925_v21 }
 0x23f   : > { %v1948_v45 = vrot.slane %v1661_v3, 2  ;;  %v1944_v43 = vsel %vm682_vm2, %v1941_v60, %v1943_v5  ;;  %v1945_v16 = vrot.slane %v5004_v48, 2  ;;  %3198 = vmatpush3.bf16.msra.mxu1 %v3925_v21 }
 0x240   : > { %3733 = vrot.lane.b32.xlu1 %v3732_v1, %s3969_s8  ;;  %3743 = vrot.lane.b32.xlu0 %v3742_v40, %s3969_s8  ;;  %v1942_v18 = vsel %vm682_vm2, %v1940_v7, %v1941_v60  ;;  %v2484_v40 = vsel %vm1305_vm5, %v3927_v57, 0 }
 0x241   : > { %v3757_v8 = vpack.i.bf16 %v1944_v43, %v1942_v18  ;;  %v1947_v3 = vsel %vm682_vm2, %v1945_v16, %v1946_v36  ;;  %v1949_v25 = vsel %vm682_vm2, %v1946_v36, %v1948_v45  ;;  %3199 = vmatprep.subr.bf16.mxu1 %v3926_v24 }
 0x242   : > { %v3762_v54 = vpack.i.bf16 %v1949_v25, %v1947_v3 }
 0x243   : > { %3200 = vmatpush3.bf16.msra.mxu1 %v3926_v24 }
 0x244   : > { %3753 = vrot.lane.b32.xlu1 %v3752_v33, %s3968_s30  ;;  %3748 = vrot.lane.b32.xlu0 %v3747_v12, %s3968_s30 }
 0x245   : > { %3277 = vmatprep.subr.msk.bf16.mxu1 %vm1305_vm5, %v3927_v57 }
 0x247   : > { %3202 = vmatpush3.bf16.msra.mxu1 %v2484_v40 }
 0x248   : > { %3758 = vrot.lane.b32.xlu1 %v3757_v8, %s3969_s8 }
 0x24c   : > { %3763 = vrot.lane.b32.xlu1 %v3762_v54, %s3969_s8 }
 0x26b   : > { %v3614_v59 = vpop.permute.xlu0 %3613  ;;  %v3609_v6 = vpop.permute.xlu1 %3608 }
 0x26c   : > { %v3616_v51 = vunpack.i.h.bf16 %v3614_v59  ;;  %v3615_v27 = vunpack.i.l.bf16 %v3614_v59  ;;  %v3611_v50 = vunpack.i.h.bf16 %v3609_v6  ;;  %v3610_v42 = vunpack.i.l.bf16 %v3609_v6 }
 0x26e   : > { %v2049_v62 = vsel %vm859_vm3, %v4692_v38, %v3611_v50  ;;  %v2048_v56 = vsel %vm859_vm3, %v4689_v28, %v3610_v42 }
 0x26f   : > { %v5053_v13 = vsel %vm892_vm4, %v2048_v56, %v3615_v27  ;;  %v5056_v17 = vsel %vm892_vm4, %v2049_v62, %v3616_v51 }
 0x270   : > { %v3767_v1 = vpack.i.bf16 %v5056_v17, %v5053_v13 }
 0x271   : > { %v3619_v60 = vpop.permute.xlu0 %3618 }
 0x272   : > { %3768 = vrot.lane.b32.xlu1 %v3767_v1, %s3970_s13  ;;  %v3621_v5 = vunpack.i.h.bf16 %v3619_v60  ;;  %v3620_v38 = vunpack.i.l.bf16 %v3619_v60 }
 0x274   : > { %v2047_v33 = vsel %vm859_vm3, %v4698_v9, %v3621_v5  ;;  %v2046_v7 = vsel %vm859_vm3, %v4705_v15, %v3620_v38 }
 0x275   : > { %v3624_v31 = vpop.permute.xlu0 %3623  ;;  %v3639_v45 = vpop.permute.xlu1 %3638 }
 0x276   : > { %v3626_v20 = vunpack.i.h.bf16 %v3624_v31  ;;  %v3625_v28 = vunpack.i.l.bf16 %v3624_v31  ;;  %v3641_v21 = vunpack.i.h.bf16 %v3639_v45  ;;  %v3640_v24 = vunpack.i.l.bf16 %v3639_v45 }
 0x278   : > { %v5067_v12 = vsel %vm892_vm4, %v2046_v7, %v3625_v28  ;;  %v5070_v36 = vsel %vm892_vm4, %v2047_v33, %v3626_v20  ;;  %v2051_v59 = vsel %vm859_vm3, %v4733_v14, %v3641_v21  ;;  %v2050_v6 = vsel %vm859_vm3, %v4719_v39, %v3640_v24 }
 0x279   : > { %v3629_v18 = vpop.permute.xlu0 %3628  ;;  %v3772_v43 = vpack.i.bf16 %v5070_v36, %v5067_v12 }
 0x27a   : > { %v3631_v16 = vunpack.i.h.bf16 %v3629_v18  ;;  %v3630_v9 = vunpack.i.l.bf16 %v3629_v18 }
 0x27b   : > { %3773 = vrot.lane.b32.xlu0 %v3772_v43, %s3970_s13 }
 0x27c   : > { %v2053_v51 = vsel %vm859_vm3, %v4727_v41, %v3631_v16  ;;  %v2052_v27 = vsel %vm859_vm3, %v4716_v53, %v3630_v9 }
 0x27e   : > { %v3644_v8 = vpop.permute.xlu1 %3643 }
 0x27f   : > { %v3634_v3 = vpop.permute.xlu0 %3633  ;;  %3778 = vrot.lane.b32.xlu0 %v3767_v1, %s3971_s16  ;;  %v3646_v15 = vunpack.i.h.bf16 %v3644_v8  ;;  %v3645_v25 = vunpack.i.l.bf16 %v3644_v8 }
 0x280   : > { %v3636_v54 = vunpack.i.h.bf16 %v3634_v3  ;;  %v3635_v57 = vunpack.i.l.bf16 %v3634_v3 }
 0x281   : > { %v5085_v50 = vsel %vm892_vm4, %v2050_v6, %v3645_v25  ;;  %v5088_v42 = vsel %vm892_vm4, %v2051_v59, %v3646_v15 }
 0x282   : > { %v5091_v62 = vsel %vm892_vm4, %v2052_v27, %v3635_v57  ;;  %v5094_v14 = vsel %vm892_vm4, %v2053_v51, %v3636_v54  ;;  %v3782_v39 = vpack.i.bf16 %v5088_v42, %v5085_v50 }
 0x283   : > { %v3787_v53 = vpack.i.bf16 %v5094_v14, %v5091_v62 }
 0x284   : > { %v3659_v56 = vpop.permute.xlu1 %3658  ;;  %3783 = vrot.lane.b32.xlu1 %v3782_v39, %s3971_s16  ;;  %3793 = vrot.lane.b32.xlu0 %v3782_v39, %s3970_s13 }
 0x285   : > { %v3661_v41 = vunpack.i.h.bf16 %v3659_v56  ;;  %v3660_v1 = vunpack.i.l.bf16 %v3659_v56 }
 0x286   : > { %v3649_v40 = vpop.permute.xlu0 %3648 }
 0x287   : > { %v3651_v60 = vunpack.i.h.bf16 %v3649_v40  ;;  %v3650_v5 = vunpack.i.l.bf16 %v3649_v40  ;;  %v2055_v28 = vsel %vm859_vm3, %v4780_v23, %v3661_v41  ;;  %v2054_v33 = vsel %vm859_vm3, %v4774_v4, %v3660_v1 }
 0x288   : > { %v3664_v38 = vpop.permute.xlu1 %3663  ;;  %3788 = vrot.lane.b32.xlu1 %v3787_v53, %s3970_s13  ;;  %3798 = vrot.lane.b32.xlu0 %v3787_v53, %s3971_s16 }
 0x289   : > { %v3666_v31 = vunpack.i.h.bf16 %v3664_v38  ;;  %v3665_v20 = vunpack.i.l.bf16 %v3664_v38  ;;  %v2057_v24 = vsel %vm859_vm3, %v4761_v0, %v3651_v60  ;;  %v2056_v16 = vsel %vm859_vm3, %v4767_v46, %v3650_v5 }
 0x28a   : > { %v3654_v7 = vpop.permute.xlu0 %3653 }
 0x28b   : > { %v5109_v45 = vsel %vm892_vm4, %v2054_v33, %v3665_v20  ;;  %v5112_v18 = vsel %vm892_vm4, %v2055_v28, %v3666_v31  ;;  %v3656_v43 = vunpack.i.h.bf16 %v3654_v7  ;;  %v3655_v21 = vunpack.i.l.bf16 %v3654_v7 }
 0x28c   : > { %v3802_v23 = vpack.i.bf16 %v5112_v18, %v5109_v45 }
 0x28d   : > { %v5121_v4 = vsel %vm892_vm4, %v2056_v16, %v3655_v21  ;;  %v5124_v9 = vsel %vm892_vm4, %v2057_v24, %v3656_v43 }
 0x28e   : > { %3803 = vrot.lane.b32.xlu1 %v3802_v23, %s3971_s16  ;;  %3813 = vrot.lane.b32.xlu0 %v3802_v23, %s3970_s13  ;;  %v3807_v8 = vpack.i.bf16 %v5124_v9, %v5121_v4  ;;  %v3674_v0 = vpop.permute.xlu1 %3673 }
 0x28f   : > { %v3676_v15 = vunpack.i.h.bf16 %v3674_v0  ;;  %v3675_v46 = vunpack.i.l.bf16 %v3674_v0 }
 0x290   : > { %v3669_v3 = vpop.permute.xlu0 %3668 }
 0x291   : > { %v3671_v25 = vunpack.i.h.bf16 %v3669_v3  ;;  %v3670_v54 = vunpack.i.l.bf16 %v3669_v3  ;;  %v2059_v27 = vsel %vm859_vm3, %v4814_v34, %v3676_v15  ;;  %v2058_v39 = vsel %vm859_vm3, %v4804_v30, %v3675_v46 }
 0x292   : > { %3808 = vrot.lane.b32.xlu1 %v3807_v8, %s3970_s13  ;;  %3818 = vrot.lane.b32.xlu0 %v3807_v8, %s3971_s16 }
 0x293   : > { %v3679_v57 = vpop.permute.xlu1 %3678  ;;  %v2061_v41 = vsel %vm859_vm3, %v4811_v22, %v3671_v25  ;;  %v2060_v1 = vsel %vm859_vm3, %v4801_v55, %v3670_v54 }
 0x294   : > { %v3681_v59 = vunpack.i.h.bf16 %v3679_v57  ;;  %v3680_v6 = vunpack.i.l.bf16 %v3679_v57  ;;  %v3689_v51 = vpop.permute.xlu0 %3688 }
 0x295   : > { %v3691_v56 = vunpack.i.h.bf16 %v3689_v51  ;;  %v3690_v53 = vunpack.i.l.bf16 %v3689_v51 }
 0x296   : > { %v5141_v40 = vsel %vm892_vm4, %v2058_v39, %v3680_v6  ;;  %v5144_v60 = vsel %vm892_vm4, %v2059_v27, %v3681_v59 }
 0x297   : > { %v5147_v5 = vsel %vm892_vm4, %v2060_v1, %v3690_v53  ;;  %v5150_v34 = vsel %vm892_vm4, %v2061_v41, %v3691_v56  ;;  %v3822_v30 = vpack.i.bf16 %v5144_v60, %v5141_v40 }
 0x298   : > { %v3827_v55 = vpack.i.bf16 %v5150_v34, %v5147_v5 }
 0x299   : > { %v3684_v38 = vpop.permute.xlu1 %3683  ;;  %3823 = vrot.lane.b32.xlu1 %v3822_v30, %s3971_s16  ;;  %3833 = vrot.lane.b32.xlu0 %v3822_v30, %s3970_s13 }
 0x29a   : > { %v3686_v22 = vunpack.i.h.bf16 %v3684_v38  ;;  %v3685_v31 = vunpack.i.l.bf16 %v3684_v38 }
 0x29b   : > { %v3699_v20 = vpop.permute.xlu0 %3698 }
 0x29c   : > { %v3701_v28 = vunpack.i.h.bf16 %v3699_v20  ;;  %v3700_v33 = vunpack.i.l.bf16 %v3699_v20  ;;  %v2063_v24 = vsel %vm859_vm3, %v4864_v35, %v3686_v22  ;;  %v2062_v16 = vsel %vm859_vm3, %v4852_v47, %v3685_v31 }
 0x29d   : > { %v3694_v7 = vpop.permute.xlu1 %3693  ;;  %3828 = vrot.lane.b32.xlu1 %v3827_v55, %s3970_s13  ;;  %3838 = vrot.lane.b32.xlu0 %v3827_v55, %s3971_s16 }
 0x29e   : > { %v3696_v43 = vunpack.i.h.bf16 %v3694_v7  ;;  %v3695_v21 = vunpack.i.l.bf16 %v3694_v7  ;;  %v2065_v46 = vsel %vm859_vm3, %v4855_v2, %v3701_v28  ;;  %v2064_v25 = vsel %vm859_vm3, %v4849_v63, %v3700_v33 }
 0x29f   : > { %v3709_v23 = vpop.permute.xlu0 %3708 }
 0x2a0   : > { %v5165_v8 = vsel %vm892_vm4, %v2062_v16, %v3695_v21  ;;  %v5168_v0 = vsel %vm892_vm4, %v2063_v24, %v3696_v43  ;;  %v3711_v3 = vunpack.i.h.bf16 %v3709_v23  ;;  %v3710_v15 = vunpack.i.l.bf16 %v3709_v23 }
 0x2a1   : > { %v3842_v35 = vpack.i.bf16 %v5168_v0, %v5165_v8 }
 0x2a2   : > { %v5177_v47 = vsel %vm892_vm4, %v2064_v25, %v3710_v15  ;;  %v5180_v54 = vsel %vm892_vm4, %v2065_v46, %v3711_v3 }
 0x2a3   : > { %3843 = vrot.lane.b32.xlu1 %v3842_v35, %s3971_s16  ;;  %3848 = vrot.lane.b32.xlu0 %v3842_v35, %s3970_s13  ;;  %v3852_v57 = vpack.i.bf16 %v5180_v54, %v5177_v47 }
 0x2a4   : > { %v3704_v2 = vpop.permute.xlu1 %3703 }
 0x2a5   : > { %v3719_v59 = vpop.permute.xlu0 %3718  ;;  %v3706_v6 = vunpack.i.h.bf16 %v3704_v2  ;;  %v3705_v63 = vunpack.i.l.bf16 %v3704_v2 }
 0x2a6   : > { %v3721_v51 = vunpack.i.h.bf16 %v3719_v59  ;;  %v3720_v27 = vunpack.i.l.bf16 %v3719_v59 }
 0x2a7   : > { %3853 = vrot.lane.b32.xlu1 %v3852_v57, %s3970_s13  ;;  %3858 = vrot.lane.b32.xlu0 %v3852_v57, %s3971_s16  ;;  %v2067_v1 = vsel %vm859_vm3, %v4908_v49, %v3706_v6  ;;  %v2066_v30 = vsel %vm859_vm3, %v4896_v19, %v3705_v63 }
 0x2a8   : > { %v3714_v39 = vpop.permute.xlu1 %3713  ;;  %v2069_v22 = vsel %vm859_vm3, %v4899_v32, %v3721_v51  ;;  %v2068_v31 = vsel %vm859_vm3, %v4891_v61, %v3720_v27 }
 0x2a9   : > { %v3716_v56 = vunpack.i.h.bf16 %v3714_v39  ;;  %v3715_v53 = vunpack.i.l.bf16 %v3714_v39  ;;  %v3729_v41 = vpop.permute.xlu0 %3728 }
 0x2aa   : > { %v3731_v38 = vunpack.i.h.bf16 %v3729_v41  ;;  %v3730_v55 = vunpack.i.l.bf16 %v3729_v41 }
 0x2ab   : > { %v5197_v20 = vsel %vm892_vm4, %v2066_v30, %v3715_v53  ;;  %v5200_v28 = vsel %vm892_vm4, %v2067_v1, %v3716_v56 }
 0x2ac   : > { %v5203_v33 = vsel %vm892_vm4, %v2068_v31, %v3730_v55  ;;  %v5206_v49 = vsel %vm892_vm4, %v2069_v22, %v3731_v38  ;;  %v3862_v19 = vpack.i.bf16 %v5200_v28, %v5197_v20 }
 0x2ad   : > { %v3872_v61 = vpack.i.bf16 %v5206_v49, %v5203_v33 }
 0x2ae   : > { %v3724_v7 = vpop.permute.xlu1 %3723  ;;  %3863 = vrot.lane.b32.xlu1 %v3862_v19, %s3971_s16  ;;  %v3739_v32 = vpop.permute.xlu0 %3738  ;;  %3868 = vrot.lane.b32.xlu0 %v3862_v19, %s3970_s13 }
 0x2af   : > { %v3726_v43 = vunpack.i.h.bf16 %v3724_v7  ;;  %v3725_v21 = vunpack.i.l.bf16 %v3724_v7  ;;  %v3741_v24 = vunpack.i.h.bf16 %v3739_v32  ;;  %v3740_v16 = vunpack.i.l.bf16 %v3739_v32 }
 0x2b1   : > { %v2071_v57 = vsel %vm859_vm3, %v4958_v52, %v3726_v43  ;;  %v2070_v2 = vsel %vm859_vm3, %v4948_v26, %v3725_v21  ;;  %v2073_v59 = vsel %vm859_vm3, %v4955_v44, %v3741_v24  ;;  %v2072_v6 = vsel %vm859_vm3, %v4944_v29, %v3740_v16  ;;  %v2695_v24 = vld [vmem:[%s5584_s5] sm:$0x3] }
 0x2b2   : > { %v3734_v23 = vpop.permute.xlu1 %3733  ;;  %3873 = vrot.lane.b32.xlu1 %v3872_v61, %s3970_s13  ;;  %v3744_v3 = vpop.permute.xlu0 %3743  ;;  %3878 = vrot.lane.b32.xlu0 %v3872_v61, %s3971_s16 }
 0x2b3   : > { %v3736_v15 = vunpack.i.h.bf16 %v3734_v23  ;;  %v3735_v46 = vunpack.i.l.bf16 %v3734_v23  ;;  %v3746_v25 = vunpack.i.h.bf16 %v3744_v3  ;;  %v3745_v35 = vunpack.i.l.bf16 %v3744_v3  ;;  %3278 = vmatprep.subr.msk.bf16.mxu0 %vm1305_vm5, %v2695_v24 }
 0x2b4   : > { %v2752_v3 = vsel %vm1305_vm5, %v2695_v24, 0 }
 0x2b5   : > { %v5225_v63 = vsel %vm892_vm4, %v2070_v2, %v3735_v46  ;;  %v5228_v51 = vsel %vm892_vm4, %v2071_v57, %v3736_v15  ;;  %v5231_v27 = vsel %vm892_vm4, %v2072_v6, %v3745_v35  ;;  %v5234_v52 = vsel %vm892_vm4, %v2073_v59, %v3746_v25  ;;  %3236 = vmatpush3.bf16.msra.mxu0 %v2752_v3 }
 0x2b6   : > { %v3754_v39 = vpop.permute.xlu1 %3753  ;;  %v3882_v26 = vpack.i.bf16 %v5228_v51, %v5225_v63  ;;  %v3892_v29 = vpack.i.bf16 %v5234_v52, %v5231_v27  ;;  %v3749_v53 = vpop.permute.xlu0 %3748 }
 0x2b7   : > { %v3756_v44 = vunpack.i.h.bf16 %v3754_v39  ;;  %v3755_v56 = vunpack.i.l.bf16 %v3754_v39  ;;  %v3751_v22 = vunpack.i.h.bf16 %v3749_v53  ;;  %v3750_v31 = vunpack.i.l.bf16 %v3749_v53 }
 0x2b8   : > { %3883 = vrot.lane.b32.xlu1 %v3882_v26, %s3971_s16  ;;  %3888 = vrot.lane.b32.xlu0 %v3882_v26, %s3970_s13 }
 0x2b9   : > { %v2075_v38 = vsel %vm859_vm3, %v4999_v11, %v3756_v44  ;;  %v2074_v55 = vsel %vm859_vm3, %v4988_v10, %v3755_v56  ;;  %v2077_v10 = vsel %vm859_vm3, %v4991_v37, %v3751_v22  ;;  %v2076_v21 = vsel %vm859_vm3, %v5004_v48, %v3750_v31 }
 0x2ba   : > { %v3759_v41 = vpop.permute.xlu1 %3758 }
 0x2bb   : > { %v3761_v1 = vunpack.i.h.bf16 %v3759_v41  ;;  %v3760_v30 = vunpack.i.l.bf16 %v3759_v41 }
 0x2bc   : > { %3893 = vrot.lane.b32.xlu1 %v3892_v29, %s3970_s13  ;;  %3898 = vrot.lane.b32.xlu0 %v3892_v29, %s3971_s16 }
 0x2bd   : > { %v5249_v19 = vsel %vm892_vm4, %v2074_v55, %v3760_v30  ;;  %v5252_v7 = vsel %vm892_vm4, %v2075_v38, %v3761_v1 }
 0x2be   : > { %v3764_v32 = vpop.permute.xlu1 %3763  ;;  %v3902_v61 = vpack.i.bf16 %v5252_v7, %v5249_v19 }
 0x2bf   : > { %v3766_v11 = vunpack.i.h.bf16 %v3764_v32  ;;  %v3765_v43 = vunpack.i.l.bf16 %v3764_v32 }
 0x2c0   : > { %3903 = vrot.lane.b32.xlu1 %v3902_v61, %s3971_s16  ;;  %3908 = vrot.lane.b32.xlu0 %v3902_v61, %s3970_s13 }
 0x2c1   : > { %v2108_v16 = vsel %vm892_vm4, %v2076_v21, %v3765_v43  ;;  %v2109_v23 = vsel %vm892_vm4, %v2077_v10, %v3766_v11 }
 0x2c2   : > { %v3917_v37 = vpack.i.bf16 %v2109_v23, %v2108_v16 }
 0x2c4   : > { %3913 = vrot.lane.b32.xlu1 %v3917_v37, %s3970_s13  ;;  %3918 = vrot.lane.b32.xlu0 %v3917_v37, %s3971_s16 }
 0x2e4   : > { %v3769_v35 = vpop.permute.xlu1 %3768 }
 0x2e5   : > { %v3771_v44 = vunpack.i.h.bf16 %v3769_v35  ;;  %v3770_v56 = vunpack.i.l.bf16 %v3769_v35 }
 0x2e7   : > { %v2330_v38 = vsel %vm1147_vm6, %v5067_v12, %v3770_v56  ;;  %v2331_v55 = vsel %vm1147_vm6, %v5070_v36, %v3771_v44 }
 0x2ed   : > { %v3774_v48 = vpop.permute.xlu0 %3773 }
 0x2ee   : > { %v3776_v15 = vunpack.i.h.bf16 %v3774_v48  ;;  %v3775_v46 = vunpack.i.l.bf16 %v3774_v48 }
 0x2f0   : > { %v2329_v59 = vsel %vm1147_vm6, 0.0, %v3776_v15  ;;  %v2328_v6 = vsel %vm1147_vm6, 0.0, %v3775_v46 }
 0x2f1   : > { %v3779_v25 = vpop.permute.xlu0 %3778 }
 0x2f2   : > { %v3781_v57 = vunpack.i.h.bf16 %v3779_v25  ;;  %v3780_v2 = vunpack.i.l.bf16 %v3779_v25 }
 0x2f4   : > { %v2360_v39 = vsel %vm1180_vm7, %v2328_v6, %v3780_v2  ;;  %v2361_v26 = vsel %vm1180_vm7, %v2329_v59, %v3781_v57 }
 0x2f5   : > { %v2392_v29 = vpack.c.bf16 %v2361_v26, %v2360_v39 }
 0x2f6   : > { %v3784_v53 = vpop.permute.xlu1 %3783  ;;  %v3794_v41 = vpop.permute.xlu0 %3793 }
 0x2f7   : > { %3203 = vmatprep.mubr.msk.bf16.mxu1 %vm1256_vm8, %v2392_v29  ;;  %v3786_v1 = vunpack.i.h.bf16 %v3784_v53  ;;  %v3785_v30 = vunpack.i.l.bf16 %v3784_v53  ;;  %v3796_v22 = vunpack.i.h.bf16 %v3794_v41  ;;  %v3795_v31 = vunpack.i.l.bf16 %v3794_v41 }
 0x2f9   : > { %v2362_v32 = vsel %vm1180_vm7, %v2330_v38, %v3785_v30  ;;  %v2363_v61 = vsel %vm1180_vm7, %v2331_v55, %v3786_v1  ;;  %v2333_v16 = vsel %vm1147_vm6, %v5056_v17, %v3796_v22  ;;  %v2332_v12 = vsel %vm1147_vm6, %v5053_v13, %v3795_v31 }
 0x2fa   : > { %v2393_v11 = vpack.c.bf16 %v2363_v61, %v2362_v32  ;;  %v3789_v43 = vpop.permute.xlu1 %3788  ;;  %v3799_v10 = vpop.permute.xlu0 %3798 }
 0x2fb   : > { %v3801_v21 = vunpack.i.h.bf16 %v3799_v10  ;;  %v3800_v24 = vunpack.i.l.bf16 %v3799_v10  ;;  %v3791_v36 = vunpack.i.h.bf16 %v3789_v43  ;;  %v3790_v23 = vunpack.i.l.bf16 %v3789_v43 }
 0x2fc   : > { %3204 = vmatmul.mubr.msk.bf16.vlgmr.msra.gmra.mrb[16].mxu1 %vm1256_vm8, %v2393_v11 }
 0x2fd   : > { %v2364_v3 = vsel %vm1180_vm7, %v2332_v12, %v3800_v24  ;;  %v2365_v37 = vsel %vm1180_vm7, %v2333_v16, %v3801_v21  ;;  %v2335_v17 = vsel %vm1147_vm6, %v5088_v42, %v3791_v36  ;;  %v2334_v13 = vsel %vm1147_vm6, %v5085_v50, %v3790_v23 }
 0x2fe   : > { %v2394_v48 = vpack.c.bf16 %v2365_v37, %v2364_v3 }
 0x300   : > { %v3804_v15 = vpop.permute.xlu1 %3803  ;;  %v3814_v46 = vpop.permute.xlu0 %3813  ;;  %3207 = vmatprep.mubr.msk.bf16.mxu1 %vm1256_vm8, %v2394_v48 }
 0x301   : > { %v3806_v25 = vunpack.i.h.bf16 %v3804_v15  ;;  %v3805_v35 = vunpack.i.l.bf16 %v3804_v15  ;;  %v3816_v57 = vunpack.i.h.bf16 %v3814_v46  ;;  %v3815_v2 = vunpack.i.l.bf16 %v3814_v46 }
 0x303   : > { %v2366_v59 = vsel %vm1180_vm7, %v2334_v13, %v3805_v35  ;;  %v2367_v6 = vsel %vm1180_vm7, %v2335_v17, %v3806_v25  ;;  %v2337_v53 = vsel %vm1147_vm6, %v5094_v14, %v3816_v57  ;;  %v2336_v42 = vsel %vm1147_vm6, %v5091_v62, %v3815_v2 }
 0x304   : > { %v2395_v39 = vpack.c.bf16 %v2367_v6, %v2366_v59  ;;  %v3819_v26 = vpop.permute.xlu0 %3818  ;;  %v3809_v44 = vpop.permute.xlu1 %3808 }
 0x305   : > { %v3821_v56 = vunpack.i.h.bf16 %v3819_v26  ;;  %v3820_v29 = vunpack.i.l.bf16 %v3819_v26  ;;  %v3811_v30 = vunpack.i.h.bf16 %v3809_v44  ;;  %v3810_v38 = vunpack.i.l.bf16 %v3809_v44 }
 0x306   : > { %3208 = vmatmul.mubr.msk.bf16.gmra.mrb[20].mxu1 %vm1256_vm8, %v2395_v39 }
 0x307   : > { %v2368_v50 = vsel %vm1180_vm7, %v2336_v42, %v3820_v29  ;;  %v2369_v41 = vsel %vm1180_vm7, %v2337_v53, %v3821_v56  ;;  %v2339_v14 = vsel %vm1147_vm6, %v5112_v18, %v3811_v30  ;;  %v2338_v62 = vsel %vm1147_vm6, %v5109_v45, %v3810_v38 }
 0x308   : > { %v2396_v1 = vpack.c.bf16 %v2369_v41, %v2368_v50 }
 0x30a   : > { %3211 = vmatprep.mubr.msk.bf16.mxu1 %vm1256_vm8, %v2396_v1 }
 0x30b   : > { %v3824_v55 = vpop.permute.xlu1 %3823  ;;  %v3834_v22 = vpop.permute.xlu0 %3833 }
 0x30c   : > { %v3826_v31 = vunpack.i.h.bf16 %v3824_v55  ;;  %v3825_v32 = vunpack.i.l.bf16 %v3824_v55  ;;  %v3836_v61 = vunpack.i.h.bf16 %v3834_v22  ;;  %v3835_v11 = vunpack.i.l.bf16 %v3834_v22 }
 0x30e   : > { %v2370_v43 = vsel %vm1180_vm7, %v2338_v62, %v3825_v32  ;;  %v2371_v10 = vsel %vm1180_vm7, %v2339_v14, %v3826_v31  ;;  %v2341_v23 = vsel %vm1147_vm6, %v5124_v9, %v3836_v61  ;;  %v2340_v18 = vsel %vm1147_vm6, %v5121_v4, %v3835_v11 }
 0x30f   : > { %v2397_v21 = vpack.c.bf16 %v2371_v10, %v2370_v43  ;;  %v3829_v24 = vpop.permute.xlu1 %3828  ;;  %v3839_v16 = vpop.permute.xlu0 %3838 }
 0x310   : > { %v3841_v12 = vunpack.i.h.bf16 %v3839_v16  ;;  %v3840_v36 = vunpack.i.l.bf16 %v3839_v16  ;;  %v3831_v37 = vunpack.i.h.bf16 %v3829_v24  ;;  %v3830_v48 = vunpack.i.l.bf16 %v3829_v24 }
 0x311   : > { %3212 = vmatmul.mubr.msk.bf16.gmra.mrb[24].mxu1 %vm1256_vm8, %v2397_v21 }
 0x312   : > { %v2372_v45 = vsel %vm1180_vm7, %v2340_v18, %v3840_v36  ;;  %v2373_v3 = vsel %vm1180_vm7, %v2341_v23, %v3841_v12  ;;  %v2343_v9 = vsel %vm1147_vm6, %v5144_v60, %v3831_v37  ;;  %v2342_v4 = vsel %vm1147_vm6, %v5141_v40, %v3830_v48 }
 0x313   : > { %v2398_v15 = vpack.c.bf16 %v2373_v3, %v2372_v45 }
 0x315   : > { %v3844_v46 = vpop.permute.xlu1 %3843  ;;  %v3849_v25 = vpop.permute.xlu0 %3848  ;;  %3215 = vmatprep.mubr.msk.bf16.mxu1 %vm1256_vm8, %v2398_v15 }
 0x316   : > { %v3846_v35 = vunpack.i.h.bf16 %v3844_v46  ;;  %v3845_v17 = vunpack.i.l.bf16 %v3844_v46  ;;  %v3851_v13 = vunpack.i.h.bf16 %v3849_v25  ;;  %v3850_v57 = vunpack.i.l.bf16 %v3849_v25 }
 0x318   : > { %v2374_v2 = vsel %vm1180_vm7, %v2342_v4, %v3845_v17  ;;  %v2375_v59 = vsel %vm1180_vm7, %v2343_v9, %v3846_v35  ;;  %v2345_v29 = vsel %vm1147_vm6, %v5150_v34, %v3851_v13  ;;  %v2344_v60 = vsel %vm1147_vm6, %v5147_v5, %v3850_v57 }
 0x319   : > { %v2399_v6 = vpack.c.bf16 %v2375_v59, %v2374_v2  ;;  %v3859_v39 = vpop.permute.xlu0 %3858  ;;  %v3854_v26 = vpop.permute.xlu1 %3853 }
 0x31a   : > { %v3861_v44 = vunpack.i.h.bf16 %v3859_v39  ;;  %v3860_v56 = vunpack.i.l.bf16 %v3859_v39  ;;  %v3856_v50 = vunpack.i.h.bf16 %v3854_v26  ;;  %v3855_v41 = vunpack.i.l.bf16 %v3854_v26 }
 0x31b   : > { %3216 = vmatmul.mubr.msk.bf16.gmra.mrb[28].mxu1 %vm1256_vm8, %v2399_v6 }
 0x31c   : > { %v2376_v40 = vsel %vm1180_vm7, %v2344_v60, %v3860_v56  ;;  %v2377_v53 = vsel %vm1180_vm7, %v2345_v29, %v3861_v44  ;;  %v2347_v34 = vsel %vm1147_vm6, %v5168_v0, %v3856_v50  ;;  %v2346_v5 = vsel %vm1147_vm6, %v5165_v8, %v3855_v41 }
 0x31d   : > { %v2400_v42 = vpack.c.bf16 %v2377_v53, %v2376_v40 }
 0x31f   : > { %3219 = vmatprep.mubr.msk.bf16.mxu1 %vm1256_vm8, %v2400_v42 }
 0x320   : > { %v3864_v1 = vpop.permute.xlu1 %3863  ;;  %v3869_v30 = vpop.permute.xlu0 %3868 }
 0x321   : > { %v3866_v38 = vunpack.i.h.bf16 %v3864_v1  ;;  %v3865_v55 = vunpack.i.l.bf16 %v3864_v1  ;;  %v3871_v22 = vunpack.i.h.bf16 %v3869_v30  ;;  %v3870_v31 = vunpack.i.l.bf16 %v3869_v30 }
 0x323   : > { %v2378_v32 = vsel %vm1180_vm7, %v2346_v5, %v3865_v55  ;;  %v2379_v14 = vsel %vm1180_vm7, %v2347_v34, %v3866_v38  ;;  %v2349_v21 = vsel %vm1147_vm6, %v5180_v54, %v3871_v22  ;;  %v2348_v0 = vsel %vm1147_vm6, %v5177_v47, %v3870_v31 }
 0x324   : > { %v2401_v62 = vpack.c.bf16 %v2379_v14, %v2378_v32  ;;  %v3874_v61 = vpop.permute.xlu1 %3873  ;;  %v3879_v11 = vpop.permute.xlu0 %3878 }
 0x325   : > { %v3881_v43 = vunpack.i.h.bf16 %v3879_v11  ;;  %v3880_v10 = vunpack.i.l.bf16 %v3879_v11  ;;  %v3876_v16 = vunpack.i.h.bf16 %v3874_v61  ;;  %v3875_v12 = vunpack.i.l.bf16 %v3874_v61 }
 0x326   : > { %3220 = vmatmul.mubr.msk.bf16.gmra.mrb[32].mxu1 %vm1256_vm8, %v2401_v62 }
 0x327   : > { %v2380_v8 = vsel %vm1180_vm7, %v2348_v0, %v3880_v10  ;;  %v2381_v24 = vsel %vm1180_vm7, %v2349_v21, %v3881_v43  ;;  %v2351_v54 = vsel %vm1147_vm6, %v5200_v28, %v3876_v16  ;;  %v2350_v47 = vsel %vm1147_vm6, %v5197_v20, %v3875_v12 }
 0x328   : > { %v2402_v36 = vpack.c.bf16 %v2381_v24, %v2380_v8 }
 0x32a   : > { %v3884_v23 = vpop.permute.xlu1 %3883  ;;  %v3889_v18 = vpop.permute.xlu0 %3888  ;;  %3223 = vmatprep.mubr.msk.bf16.mxu1 %vm1256_vm8, %v2402_v36 }
 0x32b   : > { %v3886_v45 = vunpack.i.h.bf16 %v3884_v23  ;;  %v3885_v3 = vunpack.i.l.bf16 %v3884_v23  ;;  %v3891_v37 = vunpack.i.h.bf16 %v3889_v18  ;;  %v3890_v48 = vunpack.i.l.bf16 %v3889_v18 }
 0x32d   : > { %v2382_v15 = vsel %vm1180_vm7, %v2350_v47, %v3885_v3  ;;  %v2383_v46 = vsel %vm1180_vm7, %v2351_v54, %v3886_v45  ;;  %v2353_v13 = vsel %vm1147_vm6, %v5206_v49, %v3891_v37  ;;  %v2352_v28 = vsel %vm1147_vm6, %v5203_v33, %v3890_v48 }
 0x32e   : > { %v2403_v25 = vpack.c.bf16 %v2383_v46, %v2382_v15  ;;  %v3894_v35 = vpop.permute.xlu1 %3893  ;;  %v3899_v17 = vpop.permute.xlu0 %3898 }
 0x32f   : > { %v3901_v9 = vunpack.i.h.bf16 %v3899_v17  ;;  %v3900_v4 = vunpack.i.l.bf16 %v3899_v17  ;;  %v3896_v57 = vunpack.i.h.bf16 %v3894_v35  ;;  %v3895_v2 = vunpack.i.l.bf16 %v3894_v35 }
 0x330   : > { %3224 = vmatmul.mubr.msk.bf16.gmra.mrb[36].mxu1 %vm1256_vm8, %v2403_v25 }
 0x331   : > { %v2384_v20 = vsel %vm1180_vm7, %v2352_v28, %v3900_v4  ;;  %v2385_v59 = vsel %vm1180_vm7, %v2353_v13, %v3901_v9  ;;  %v2355_v29 = vsel %vm1147_vm6, %v5228_v51, %v3896_v57  ;;  %v2354_v49 = vsel %vm1147_vm6, %v5225_v63, %v3895_v2 }
 0x332   : > { %v2404_v6 = vpack.c.bf16 %v2385_v59, %v2384_v20  ;;  %v3904_v39 = vpop.permute.xlu1 %3903  ;;  %v3909_v26 = vpop.permute.xlu0 %3908 }
 0x333   : > { %v3906_v44 = vunpack.i.h.bf16 %v3904_v39  ;;  %v3905_v56 = vunpack.i.l.bf16 %v3904_v39  ;;  %v3911_v33 = vunpack.i.h.bf16 %v3909_v26  ;;  %v3910_v60 = vunpack.i.l.bf16 %v3909_v26 }
 0x334   : > { %3227 = vmatprep.mubr.msk.bf16.mxu1 %vm1256_vm8, %v2404_v6 }
 0x335   : > { %v2386_v40 = vsel %vm1180_vm7, %v2354_v49, %v3905_v56  ;;  %v2387_v53 = vsel %vm1180_vm7, %v2355_v29, %v3906_v44  ;;  %v2357_v51 = vsel %vm1147_vm6, %v5234_v52, %v3911_v33  ;;  %v2356_v63 = vsel %vm1147_vm6, %v5231_v27, %v3910_v60 }
 0x336   : > { %v2405_v42 = vpack.c.bf16 %v2387_v53, %v2386_v40  ;;  %v3914_v50 = vpop.permute.xlu1 %3913  ;;  %v3919_v41 = vpop.permute.xlu0 %3918 }
 0x337   : > { %v3916_v1 = vunpack.i.h.bf16 %v3914_v50  ;;  %v3915_v30 = vunpack.i.l.bf16 %v3914_v50  ;;  %v3921_v38 = vunpack.i.h.bf16 %v3919_v41  ;;  %v3920_v55 = vunpack.i.l.bf16 %v3919_v41 }
 0x338   : > { %3228 = vmatmul.mubr.msk.bf16.gmra.mrb[40].mxu1 %vm1256_vm8, %v2405_v42 }
 0x339   : > { %v2359_v34 = vsel %vm1147_vm6, %v5252_v7, %v3916_v1  ;;  %v2358_v5 = vsel %vm1147_vm6, %v5249_v19, %v3915_v30  ;;  %v2388_v22 = vsel %vm1180_vm7, %v2356_v63, %v3920_v55  ;;  %v2389_v31 = vsel %vm1180_vm7, %v2357_v51, %v3921_v38  ;;  %v5386_v19 = vld [vmem:[%s5583_s4] ss:$0 sm:$0xff] }
 0x33a   : > { %v2406_v32 = vpack.c.bf16 %v2389_v31, %v2388_v22  ;;  %v2391_v14 = vsel %vm1180_vm7, %v2359_v34, %v4671_v58  ;;  %v2390_v52 = vsel %vm1180_vm7, %v2358_v5, %v4671_v58 }
 0x33b   : > { %v2407_v27 = vpack.c.bf16 %v2391_v14, %v2390_v52 }
 0x33c   : > { %3231 = vmatprep.mubr.msk.bf16.mxu1 %vm1256_vm8, %v2406_v32 }
 0x340   : > { %3232 = vmatmul.mubr.msk.bf16.gmra.mrb[44].mxu1 %vm1256_vm8, %v2407_v27 }
 0x3cf   : > { %v3205_v7 = vpop.f32.mrb[16].mxu1 }
 0x3d0   : > { %v2529_v62 = vadd.f32 %v3205_v7, %v5386_v19  ;;  %v2520_v61 = vpop.f32.mrb[17].mxu1 }
 0x3d1   : > { %v2521_v11 = vadd.f32 %v5386_v19, %v2520_v61  ;;  %v3206_v43 = vpop.f32.mrb[18].mxu1 }
 0x3d2   : > { %v2532_v10 = vadd.f32 %v3206_v43, %v5386_v19  ;;  %v2523_v58 = vpop.f32.mrb[19].mxu1  ;;  %v2649_v0 = vmax.f32 %v2529_v62, 0.0 }
 0x3d3   : > { %v2524_v21 = vadd.f32 %v5386_v19, %v2523_v58  ;;  %v2647_v24 = vmax.f32 %v2521_v11, 0.0 }
 0x3d4   : > { %v2650_v8 = vmax.f32 %v2532_v10, 0.0 }
 0x3d5   : > { %v2648_v16 = vmax.f32 %v2524_v21, 0.0 }
 0x3d6   : > { %v2680_v12 = vpack.c.bf16 %v2650_v8, %v2649_v0 }
 0x3d7   : > { %v2679_v36 = vpack.c.bf16 %v2648_v16, %v2647_v24 }
 0x3d9   : > { %v3209_v23 = vpop.f32.mrb[20].mxu1  ;;  %3237 = vmatprep.mubr.msk.bf16.mxu0 %vm859_vm3, %v2679_v36 }
 0x3da   : > { %v2545_v18 = vadd.f32 %v3209_v23, %v5386_v19  ;;  %v2536_v45 = vpop.f32.mrb[21].mxu1  ;;  %3238 = vmatmul.mubr.msk.bf16.vlgmr.msra.gmra.mrb[16].mxu0 %vm859_vm3, %v2680_v12 }
 0x3db   : > { %v2537_v3 = vadd.f32 %v5386_v19, %v2536_v45  ;;  %v3210_v54 = vpop.f32.mrb[22].mxu1 }
 0x3dc   : > { %v2548_v47 = vadd.f32 %v3210_v54, %v5386_v19  ;;  %v2539_v37 = vpop.f32.mrb[23].mxu1  ;;  %v2653_v15 = vmax.f32 %v2545_v18, 0.0 }
 0x3dd   : > { %v2540_v48 = vadd.f32 %v5386_v19, %v2539_v37  ;;  %v2651_v25 = vmax.f32 %v2537_v3, 0.0 }
 0x3de   : > { %v2654_v46 = vmax.f32 %v2548_v47, 0.0 }
 0x3df   : > { %v2652_v35 = vmax.f32 %v2540_v48, 0.0 }
 0x3e0   : > { %v2682_v17 = vpack.c.bf16 %v2654_v46, %v2653_v15 }
 0x3e1   : > { %v2681_v9 = vpack.c.bf16 %v2652_v35, %v2651_v25 }
 0x3e3   : > { %3241 = vmatprep.mubr.msk.bf16.mxu0 %vm859_vm3, %v2681_v9 }
 0x3e4   : > { %v3213_v4 = vpop.f32.mrb[24].mxu1  ;;  %3242 = vmatmul.mubr.msk.bf16.gmra.mrb[20].mxu0 %vm859_vm3, %v2682_v17 }
 0x3e5   : > { %v2561_v13 = vadd.f32 %v3213_v4, %v5386_v19  ;;  %v2552_v28 = vpop.f32.mrb[25].mxu1 }
 0x3e6   : > { %v2553_v57 = vadd.f32 %v5386_v19, %v2552_v28  ;;  %v3214_v2 = vpop.f32.mrb[26].mxu1 }
 0x3e7   : > { %v2564_v20 = vadd.f32 %v3214_v2, %v5386_v19  ;;  %v2555_v59 = vpop.f32.mrb[27].mxu1  ;;  %v2657_v39 = vmax.f32 %v2561_v13, 0.0 }
 0x3e8   : > { %v2556_v6 = vadd.f32 %v5386_v19, %v2555_v59  ;;  %v2655_v44 = vmax.f32 %v2553_v57, 0.0 }
 0x3e9   : > { %v2658_v26 = vmax.f32 %v2564_v20, 0.0 }
 0x3ea   : > { %v2656_v56 = vmax.f32 %v2556_v6, 0.0 }
 0x3eb   : > { %v2684_v29 = vpack.c.bf16 %v2658_v26, %v2657_v39 }
 0x3ec   : > { %v2683_v49 = vpack.c.bf16 %v2656_v56, %v2655_v44 }
 0x3ee   : > { %v3217_v33 = vpop.f32.mrb[28].mxu1  ;;  %3245 = vmatprep.mubr.msk.bf16.mxu0 %vm859_vm3, %v2683_v49 }
 0x3ef   : > { %v2577_v60 = vadd.f32 %v3217_v33, %v5386_v19  ;;  %v2568_v40 = vpop.f32.mrb[29].mxu1  ;;  %3246 = vmatmul.mubr.msk.bf16.gmra.mrb[24].mxu0 %vm859_vm3, %v2684_v29 }
 0x3f0   : > { %v2569_v53 = vadd.f32 %v5386_v19, %v2568_v40  ;;  %v3218_v42 = vpop.f32.mrb[30].mxu1 }
 0x3f1   : > { %v2580_v50 = vadd.f32 %v3218_v42, %v5386_v19  ;;  %v2571_v41 = vpop.f32.mrb[31].mxu1  ;;  %v2661_v30 = vmax.f32 %v2577_v60, 0.0 }
 0x3f2   : > { %v2572_v1 = vadd.f32 %v5386_v19, %v2571_v41  ;;  %v2659_v55 = vmax.f32 %v2569_v53, 0.0 }
 0x3f3   : > { %v2662_v38 = vmax.f32 %v2580_v50, 0.0 }
 0x3f4   : > { %v2660_v51 = vmax.f32 %v2572_v1, 0.0  ;;  %v5439_v1 = vld [vmem:[%s5585_s6] ss:$0 sm:$0xff] }
 0x3f5   : > { %v2686_v63 = vpack.c.bf16 %v2662_v38, %v2661_v30 }
 0x3f6   : > { %v2685_v34 = vpack.c.bf16 %v2660_v51, %v2659_v55 }
 0x3f8   : > { %3249 = vmatprep.mubr.msk.bf16.mxu0 %vm859_vm3, %v2685_v34 }
 0x3f9   : > { %v3221_v5 = vpop.f32.mrb[32].mxu1  ;;  %3250 = vmatmul.mubr.msk.bf16.gmra.mrb[28].mxu0 %vm859_vm3, %v2686_v63  ;;  %v3928_v63 = vld [vmem:[%s4029_s29 + $0x10] sm:$0xff] }
 0x3fa   : > { %v2593_v22 = vadd.f32 %v3221_v5, %v5386_v19  ;;  %v2584_v31 = vpop.f32.mrb[33].mxu1 }
 0x3fb   : > { %v2585_v32 = vadd.f32 %v5386_v19, %v2584_v31  ;;  %v3222_v14 = vpop.f32.mrb[34].mxu1  ;;  %v3929_v31 = vld [vmem:[%s4029_s29] sm:$0xff] }
 0x3fc   : > { %v2596_v52 = vadd.f32 %v3222_v14, %v5386_v19  ;;  %v2587_v27 = vpop.f32.mrb[35].mxu1  ;;  %v2665_v62 = vmax.f32 %v2593_v22, 0.0 }
 0x3fd   : > { %v2588_v7 = vadd.f32 %v5386_v19, %v2587_v27  ;;  %v2663_v11 = vmax.f32 %v2585_v32, 0.0 }
 0x3fe   : > { %v2666_v61 = vmax.f32 %v2596_v52, 0.0  ;;  %v3930_v52 = vld [vmem:[%s4029_s29 + $0x18] sm:$0xff] }
 0x3ff   : > { %v2664_v43 = vmax.f32 %v2588_v7, 0.0  ;;  %v3931_v7 = vld [vmem:[%s4029_s29 + $0x8] sm:$0xff] }
 0x400   : > { %v2688_v10 = vpack.c.bf16 %v2666_v61, %v2665_v62 }
 0x401   : > { %v2687_v58 = vpack.c.bf16 %v2664_v43, %v2663_v11 }
 0x403   : > { %v3225_v21 = vpop.f32.mrb[36].mxu1  ;;  %3253 = vmatprep.mubr.msk.bf16.mxu0 %vm859_vm3, %v2687_v58 }
 0x404   : > { %v2609_v0 = vadd.f32 %v3225_v21, %v5386_v19  ;;  %v2600_v8 = vpop.f32.mrb[37].mxu1  ;;  %3254 = vmatmul.mubr.msk.bf16.gmra.mrb[32].mxu0 %vm859_vm3, %v2688_v10  ;;  %v3932_v21 = vld [vmem:[%s4029_s29 + $0x30] sm:$0xff] }
 0x405   : > { %v2601_v24 = vadd.f32 %v5386_v19, %v2600_v8  ;;  %v3226_v16 = vpop.f32.mrb[38].mxu1 }
 0x406   : > { %v2612_v12 = vadd.f32 %v3226_v16, %v5386_v19  ;;  %v2603_v36 = vpop.f32.mrb[39].mxu1  ;;  %v2669_v18 = vmax.f32 %v2609_v0, 0.0  ;;  %v3933_v16 = vld [vmem:[%s4029_s29 + $0x20] sm:$0xff] }
 0x407   : > { %v2604_v23 = vadd.f32 %v5386_v19, %v2603_v36  ;;  %v2667_v3 = vmax.f32 %v2601_v24, 0.0 }
 0x408   : > { %v2670_v45 = vmax.f32 %v2612_v12, 0.0 }
 0x409   : > { %v2668_v54 = vmax.f32 %v2604_v23, 0.0  ;;  %v3934_v23 = vld [vmem:[%s4029_s29 + $0x38] sm:$0xff] }
 0x40a   : > { %v2690_v47 = vpack.c.bf16 %v2670_v45, %v2669_v18  ;;  %v3935_v45 = vld [vmem:[%s4029_s29 + $0x28] sm:$0xff] }
 0x40b   : > { %v2689_v37 = vpack.c.bf16 %v2668_v54, %v2667_v3  ;;  %v3229_v48 = vpop.f32.mrb[40].mxu1 }
 0x40c   : > { %v2625_v15 = vadd.f32 %v3229_v48, %v5386_v19  ;;  %v2616_v46 = vpop.f32.mrb[41].mxu1 }
 0x40d   : > { %v2617_v25 = vadd.f32 %v5386_v19, %v2616_v46  ;;  %v3230_v35 = vpop.f32.mrb[42].mxu1  ;;  %3257 = vmatprep.mubr.msk.bf16.mxu0 %vm859_vm3, %v2689_v37  ;;  %v3936_v46 = vld [vmem:[%s4029_s29 + $0x50] sm:$0xff] }
 0x40e   : > { %v2628_v17 = vadd.f32 %v3230_v35, %v5386_v19  ;;  %v2619_v9 = vpop.f32.mrb[43].mxu1  ;;  %3258 = vmatmul.mubr.msk.bf16.gmra.mrb[36].mxu0 %vm859_vm3, %v2690_v47  ;;  %v2673_v13 = vmax.f32 %v2625_v15, 0.0 }
 0x40f   : > { %v2620_v4 = vadd.f32 %v5386_v19, %v2619_v9  ;;  %v2671_v57 = vmax.f32 %v2617_v25, 0.0  ;;  %v3937_v9 = vld [vmem:[%s4029_s29 + $0x40] sm:$0xff] }
 0x410   : > { %v2674_v28 = vmax.f32 %v2628_v17, 0.0 }
 0x411   : > { %v2672_v2 = vmax.f32 %v2620_v4, 0.0 }
 0x412   : > { %v2692_v20 = vpack.c.bf16 %v2674_v28, %v2673_v13  ;;  %v3938_v28 = vld [vmem:[%s4029_s29 + $0x58] sm:$0xff] }
 0x413   : > { %v2691_v59 = vpack.c.bf16 %v2672_v2, %v2671_v57  ;;  %v3233_v6 = vpop.f32.mrb[44].mxu1  ;;  %v3939_v2 = vld [vmem:[%s4029_s29 + $0x48] sm:$0xff] }
 0x414   : > { %v2641_v39 = vadd.f32 %v3233_v6, %v5386_v19  ;;  %v2632_v26 = vpop.f32.mrb[45].mxu1 }
 0x415   : > { %v2633_v44 = vadd.f32 %v5386_v19, %v2632_v26  ;;  %v3234_v56 = vpop.f32.mrb[46].mxu1  ;;  %3261 = vmatprep.mubr.msk.bf16.mxu0 %vm859_vm3, %v2691_v59 }
 0x416   : > { %v2644_v29 = vadd.f32 %v3234_v56, %v5386_v19  ;;  %v2635_v49 = vpop.f32.mrb[47].mxu1  ;;  %3262 = vmatmul.mubr.msk.bf16.gmra.mrb[40].mxu0 %vm859_vm3, %v2692_v20  ;;  %v2677_v60 = vmax.f32 %v2641_v39, 0.0  ;;  %v3940_v56 = vld [vmem:[%s4029_s29 + $0x70] sm:$0xff] }
 0x417   : > { %v2636_v33 = vadd.f32 %v5386_v19, %v2635_v49  ;;  %v2675_v53 = vmax.f32 %v2633_v44, 0.0 }
 0x418   : > { %v2678_v40 = vmax.f32 %v2644_v29, 0.0 }
 0x419   : > { %v2676_v42 = vmax.f32 %v2636_v33, 0.0 }
 0x41a   : > { %v2694_v50 = vpack.c.bf16 %v2678_v40, %v2677_v60  ;;  %v3941_v60 = vld [vmem:[%s4029_s29 + $0x60] sm:$0xff] }
 0x41b   : > { %v2693_v41 = vpack.c.bf16 %v2676_v42, %v2675_v53  ;;  %v3942_v42 = vld [vmem:[%s4029_s29 + $0x78] sm:$0xff] }
 0x41d   : > { %3265 = vmatprep.mubr.msk.bf16.mxu0 %vm859_vm3, %v2693_v41  ;;  %v3943_v41 = vld [vmem:[%s4029_s29 + $0x68] sm:$0xff] }
 0x41e   : > { %3266 = vmatmul.mubr.msk.bf16.gmra.mrb[44].mxu0 %vm859_vm3, %v2694_v50 }
 0x4ad   : > { %v3239_v30 = vpop.f32.mrb[16].mxu0 }
 0x4ae   : > { %v2797_v19 = vadd.f32 %v3239_v30, %v5439_v1  ;;  %v2788_v38 = vpop.f32.mrb[17].mxu0 }
 0x4af   : > { %v2789_v55 = vadd.f32 %v5439_v1, %v2788_v38  ;;  %v3240_v51 = vpop.f32.mrb[18].mxu0 }
 0x4b0   : > { %v2917_v34 = vadd.f32 %v3928_v63, %v2797_v19  ;;  %v2800_v5 = vadd.f32 %v3240_v51, %v5439_v1  ;;  %v2791_v22 = vpop.f32.mrb[19].mxu0 }
 0x4b1   : > { %v2915_v32 = vadd.f32 %v3929_v31, %v2789_v55  ;;  %v2792_v14 = vadd.f32 %v5439_v1, %v2791_v22 }
 0x4b2   : > { %2949 = vst.msk [vmem:[%s5447_s14 + $0x10] sm:$0xff] %vm859_vm3, %v2917_v34  ;;  %v2918_v27 = vadd.f32 %v3930_v52, %v2800_v5  ;;  %v3944_v34 = vld [vmem:[%s4029_s29 + $0x90] sm:$0xff] }
 0x4b3   : > { %2947 = vst.msk [vmem:[%s5447_s14] sm:$0xff] %vm859_vm3, %v2915_v32  ;;  %v2916_v62 = vadd.f32 %v3931_v7, %v2792_v14  ;;  %v3945_v32 = vld [vmem:[%s4029_s29 + $0x80] sm:$0xff] }
 0x4b4   : > { %2950 = vst.msk [vmem:[%s5447_s14 + $0x18] sm:$0xff] %vm859_vm3, %v2918_v27  ;;  %v3946_v27 = vld [vmem:[%s4029_s29 + $0x98] sm:$0xff] }
 0x4b5   : > { %2948 = vst.msk [vmem:[%s5447_s14 + $0x8] sm:$0xff] %vm859_vm3, %v2916_v62  ;;  %v3947_v62 = vld [vmem:[%s4029_s29 + $0x88] sm:$0xff] }
 0x4b7   : > { %v3243_v61 = vpop.f32.mrb[20].mxu0 }
 0x4b8   : > { %v2813_v11 = vadd.f32 %v3243_v61, %v5439_v1  ;;  %v2804_v43 = vpop.f32.mrb[21].mxu0 }
 0x4b9   : > { %v2805_v10 = vadd.f32 %v5439_v1, %v2804_v43  ;;  %v3244_v58 = vpop.f32.mrb[22].mxu0 }
 0x4ba   : > { %v2921_v0 = vadd.f32 %v3932_v21, %v2813_v11  ;;  %v2816_v8 = vadd.f32 %v3244_v58, %v5439_v1  ;;  %v2807_v24 = vpop.f32.mrb[23].mxu0 }
 0x4bb   : > { %v2919_v12 = vadd.f32 %v3933_v16, %v2805_v10  ;;  %v2808_v36 = vadd.f32 %v5439_v1, %v2807_v24 }
 0x4bc   : > { %2953 = vst.msk [vmem:[%s5447_s14 + $0x30] sm:$0xff] %vm859_vm3, %v2921_v0  ;;  %v2922_v18 = vadd.f32 %v3934_v23, %v2816_v8  ;;  %v3948_v0 = vld [vmem:[%s4029_s29 + $0xb0] sm:$0xff] }
 0x4bd   : > { %2951 = vst.msk [vmem:[%s5447_s14 + $0x20] sm:$0xff] %vm859_vm3, %v2919_v12  ;;  %v2920_v3 = vadd.f32 %v3935_v45, %v2808_v36  ;;  %v3949_v12 = vld [vmem:[%s4029_s29 + $0xa0] sm:$0xff] }
 0x4be   : > { %2954 = vst.msk [vmem:[%s5447_s14 + $0x38] sm:$0xff] %vm859_vm3, %v2922_v18  ;;  %v3950_v18 = vld [vmem:[%s4029_s29 + $0xb8] sm:$0xff] }
 0x4bf   : > { %2952 = vst.msk [vmem:[%s5447_s14 + $0x28] sm:$0xff] %vm859_vm3, %v2920_v3  ;;  %v3951_v3 = vld [vmem:[%s4029_s29 + $0xa8] sm:$0xff] }
 0x4c2   : > { %v3247_v54 = vpop.f32.mrb[24].mxu0 }
 0x4c3   : > { %v2829_v47 = vadd.f32 %v3247_v54, %v5439_v1  ;;  %v2820_v37 = vpop.f32.mrb[25].mxu0 }
 0x4c4   : > { %v2821_v48 = vadd.f32 %v5439_v1, %v2820_v37  ;;  %v3248_v15 = vpop.f32.mrb[26].mxu0 }
 0x4c5   : > { %v2925_v25 = vadd.f32 %v3936_v46, %v2829_v47  ;;  %v2832_v35 = vadd.f32 %v3248_v15, %v5439_v1  ;;  %v2823_v17 = vpop.f32.mrb[27].mxu0 }
 0x4c6   : > { %v2923_v4 = vadd.f32 %v3937_v9, %v2821_v48  ;;  %v2824_v13 = vadd.f32 %v5439_v1, %v2823_v17 }
 0x4c7   : > { %2957 = vst.msk [vmem:[%s5447_s14 + $0x50] sm:$0xff] %vm859_vm3, %v2925_v25  ;;  %v2926_v57 = vadd.f32 %v3938_v28, %v2832_v35  ;;  %v3952_v25 = vld [vmem:[%s4029_s29 + $0xd0] sm:$0xff] }
 0x4c8   : > { %2955 = vst.msk [vmem:[%s5447_s14 + $0x40] sm:$0xff] %vm859_vm3, %v2923_v4  ;;  %v2924_v20 = vadd.f32 %v3939_v2, %v2824_v13  ;;  %v3953_v4 = vld [vmem:[%s4029_s29 + $0xc0] sm:$0xff] }
 0x4c9   : > { %2958 = vst.msk [vmem:[%s5447_s14 + $0x58] sm:$0xff] %vm859_vm3, %v2926_v57  ;;  %v3954_v57 = vld [vmem:[%s4029_s29 + $0xd8] sm:$0xff] }
 0x4ca   : > { %2956 = vst.msk [vmem:[%s5447_s14 + $0x48] sm:$0xff] %vm859_vm3, %v2924_v20  ;;  %v3955_v20 = vld [vmem:[%s4029_s29 + $0xc8] sm:$0xff] }
 0x4cc   : > { %v3251_v59 = vpop.f32.mrb[28].mxu0 }
 0x4cd   : > { %v2845_v6 = vadd.f32 %v3251_v59, %v5439_v1  ;;  %v2836_v39 = vpop.f32.mrb[29].mxu0 }
 0x4ce   : > { %v2837_v26 = vadd.f32 %v5439_v1, %v2836_v39  ;;  %v3252_v44 = vpop.f32.mrb[30].mxu0 }
 0x4cf   : > { %v2929_v29 = vadd.f32 %v3940_v56, %v2845_v6  ;;  %v2848_v49 = vadd.f32 %v3252_v44, %v5439_v1  ;;  %v2839_v33 = vpop.f32.mrb[31].mxu0 }
 0x4d0   : > { %v2927_v40 = vadd.f32 %v3941_v60, %v2837_v26  ;;  %v2840_v53 = vadd.f32 %v5439_v1, %v2839_v33 }
 0x4d1   : > { %2961 = vst.msk [vmem:[%s5447_s14 + $0x70] sm:$0xff] %vm859_vm3, %v2929_v29  ;;  %v2930_v50 = vadd.f32 %v3942_v42, %v2848_v49  ;;  %v3956_v29 = vld [vmem:[%s4029_s29 + $0xf0] sm:$0xff] }
 0x4d2   : > { %2959 = vst.msk [vmem:[%s5447_s14 + $0x60] sm:$0xff] %vm859_vm3, %v2927_v40  ;;  %v2928_v30 = vadd.f32 %v3943_v41, %v2840_v53  ;;  %v3957_v40 = vld [vmem:[%s4029_s29 + $0xe0] sm:$0xff] }
 0x4d3   : > { %2962 = vst.msk [vmem:[%s5447_s14 + $0x78] sm:$0xff] %vm859_vm3, %v2930_v50  ;;  %v3958_v50 = vld [vmem:[%s4029_s29 + $0xf8] sm:$0xff] }
 0x4d4   : > { %2960 = vst.msk [vmem:[%s5447_s14 + $0x68] sm:$0xff] %vm859_vm3, %v2928_v30  ;;  %v3959_v30 = vld [vmem:[%s4029_s29 + $0xe8] sm:$0xff] }
 0x4d7   : > { %v3255_v19 = vpop.f32.mrb[32].mxu0 }
 0x4d8   : > { %v2861_v38 = vadd.f32 %v3255_v19, %v5439_v1  ;;  %v2852_v55 = vpop.f32.mrb[33].mxu0 }
 0x4d9   : > { %v2853_v51 = vadd.f32 %v5439_v1, %v2852_v55  ;;  %v3256_v63 = vpop.f32.mrb[34].mxu0 }
 0x4da   : > { %v2933_v5 = vadd.f32 %v3944_v34, %v2861_v38  ;;  %v2864_v22 = vadd.f32 %v3256_v63, %v5439_v1  ;;  %v2855_v31 = vpop.f32.mrb[35].mxu0 }
 0x4db   : > { %v2931_v14 = vadd.f32 %v3945_v32, %v2853_v51  ;;  %v2856_v52 = vadd.f32 %v5439_v1, %v2855_v31 }
 0x4dc   : > { %2965 = vst.msk [vmem:[%s5447_s14 + $0x90] sm:$0xff] %vm859_vm3, %v2933_v5  ;;  %v2934_v7 = vadd.f32 %v3946_v27, %v2864_v22 }
 0x4dd   : > { %2963 = vst.msk [vmem:[%s5447_s14 + $0x80] sm:$0xff] %vm859_vm3, %v2931_v14  ;;  %v2932_v61 = vadd.f32 %v3947_v62, %v2856_v52 }
 0x4de   : > { %2966 = vst.msk [vmem:[%s5447_s14 + $0x98] sm:$0xff] %vm859_vm3, %v2934_v7 }
 0x4df   : > { %2964 = vst.msk [vmem:[%s5447_s14 + $0x88] sm:$0xff] %vm859_vm3, %v2932_v61 }
 0x4e1   : > { %v3259_v11 = vpop.f32.mrb[36].mxu0 }
 0x4e2   : > { %v2877_v43 = vadd.f32 %v3259_v11, %v5439_v1  ;;  %v2868_v10 = vpop.f32.mrb[37].mxu0 }
 0x4e3   : > { %v2869_v58 = vadd.f32 %v5439_v1, %v2868_v10  ;;  %v3260_v21 = vpop.f32.mrb[38].mxu0 }
 0x4e4   : > { %v2937_v8 = vadd.f32 %v3948_v0, %v2877_v43  ;;  %v2880_v24 = vadd.f32 %v3260_v21, %v5439_v1  ;;  %v2871_v16 = vpop.f32.mrb[39].mxu0 }
 0x4e5   : > { %v2935_v36 = vadd.f32 %v3949_v12, %v2869_v58  ;;  %v2872_v23 = vadd.f32 %v5439_v1, %v2871_v16 }
 0x4e6   : > { %2969 = vst.msk [vmem:[%s5447_s14 + $0xb0] sm:$0xff] %vm859_vm3, %v2937_v8  ;;  %v2938_v45 = vadd.f32 %v3950_v18, %v2880_v24 }
 0x4e7   : > { %2967 = vst.msk [vmem:[%s5447_s14 + $0xa0] sm:$0xff] %vm859_vm3, %v2935_v36  ;;  %v2936_v54 = vadd.f32 %v3951_v3, %v2872_v23 }
 0x4e8   : > { %2970 = vst.msk [vmem:[%s5447_s14 + $0xb8] sm:$0xff] %vm859_vm3, %v2938_v45 }
 0x4e9   : > { %2968 = vst.msk [vmem:[%s5447_s14 + $0xa8] sm:$0xff] %vm859_vm3, %v2936_v54  ;;  %v3263_v47 = vpop.f32.mrb[40].mxu0 }
 0x4ea   : > { %v2893_v37 = vadd.f32 %v3263_v47, %v5439_v1  ;;  %v2884_v48 = vpop.f32.mrb[41].mxu0 }
 0x4eb   : > { %v2885_v15 = vadd.f32 %v5439_v1, %v2884_v48  ;;  %v3264_v46 = vpop.f32.mrb[42].mxu0 }
 0x4ec   : > { %v2941_v35 = vadd.f32 %v3952_v25, %v2893_v37  ;;  %v2896_v17 = vadd.f32 %v3264_v46, %v5439_v1  ;;  %v2887_v9 = vpop.f32.mrb[43].mxu0 }
 0x4ed   : > { %v2939_v13 = vadd.f32 %v3953_v4, %v2885_v15  ;;  %v2888_v28 = vadd.f32 %v5439_v1, %v2887_v9 }
 0x4ee   : > { %2973 = vst.msk [vmem:[%s5447_s14 + $0xd0] sm:$0xff] %vm859_vm3, %v2941_v35  ;;  %v2942_v2 = vadd.f32 %v3954_v57, %v2896_v17 }
 0x4ef   : > { %2971 = vst.msk [vmem:[%s5447_s14 + $0xc0] sm:$0xff] %vm859_vm3, %v2939_v13  ;;  %v2940_v59 = vadd.f32 %v3955_v20, %v2888_v28 }
 0x4f0   : > { %2974 = vst.msk [vmem:[%s5447_s14 + $0xd8] sm:$0xff] %vm859_vm3, %v2942_v2 }
 0x4f1   : > { %2972 = vst.msk [vmem:[%s5447_s14 + $0xc8] sm:$0xff] %vm859_vm3, %v2940_v59  ;;  %v3267_v6 = vpop.f32.mrb[44].mxu0 }
 0x4f2   : > { %v2909_v39 = vadd.f32 %v3267_v6, %v5439_v1  ;;  %v2900_v26 = vpop.f32.mrb[45].mxu0 }
 0x4f3   : > { %v2901_v44 = vadd.f32 %v5439_v1, %v2900_v26  ;;  %v3268_v56 = vpop.f32.mrb[46].mxu0 }
 0x4f4   : > { %v2945_v49 = vadd.f32 %v3956_v29, %v2909_v39  ;;  %v2912_v33 = vadd.f32 %v3268_v56, %v5439_v1  ;;  %v2903_v60 = vpop.f32.mrb[47].mxu0 }
 0x4f5   : > { %v2943_v53 = vadd.f32 %v3957_v40, %v2901_v44  ;;  %v2904_v42 = vadd.f32 %v5439_v1, %v2903_v60 }
 0x4f6   : > { %2977 = vst.msk [vmem:[%s5447_s14 + $0xf0] sm:$0xff] %vm859_vm3, %v2945_v49  ;;  %v2946_v41 = vadd.f32 %v3958_v50, %v2912_v33 }
 0x4f7   : > { %2975 = vst.msk [vmem:[%s5447_s14 + $0xe0] sm:$0xff] %vm859_vm3, %v2943_v53  ;;  %v2944_v19 = vadd.f32 %v3959_v30, %v2904_v42 }
 0x4f8   : > { %2978 = vst.msk [vmem:[%s5447_s14 + $0xf8] sm:$0xff] %vm859_vm3, %v2946_v41 }
 0x4f9   : > { %2976 = vst.msk [vmem:[%s5447_s14 + $0xe8] sm:$0xff] %vm859_vm3, %v2944_v19 }
 0x4fa PF: > { %s17_s24 = sadd.s32 1, %s3966_s24  }
 0x4fb   : > { %p14_p4 = scmp.ge.s32.totalorder %s17_s24, 4  }
 0x4fd   :  { %16 = sbr.rel (!%p14_p4) target bundleno = 1 (0x1), region = 78 }

</bundles_post_ra>
